<compile_context>
chip_gen: v7x
topology: tpu7x:2x2x1
jax: 0.10.0
libtpu: 0.0.40
codegen_flags: <defaults>
</compile_context>

<pallas_src>
import functools

import jax
import jax.numpy as jnp
import numpy as np
from jax.experimental import pallas as pl
from jax.experimental.pallas import tpu as pltpu


def _perceiver_block_kernel(n_heads,
                            x_ref, lat_ref, temb_ref,
                            wmod_ref, bmod_ref,
                            wqkv_ref, bqkv_ref, wo_ref, bo_ref,
                            wfc_ref, bfc_ref, wpr_ref, bpr_ref,
                            out_ref, attn_scr):
    """One grid step = `block_b` batch elements of the full PerceiverAttentionBlock."""
    Bt, Lq, D = lat_ref.shape
    Lx = x_ref.shape[1]
    H = n_heads
    hd = D // H

    lat = lat_ref[...].astype(jnp.float32)      # (Bt, Lq, D)
    x = x_ref[...].astype(jnp.float32)          # (Bt, Lx, D)
    temb = temb_ref[...].astype(jnp.float32)    # (Bt, T)

    # ---- fused AdaLayerNorm modulation: one (Bt,T)x(T,6D) matmul covers ln_1/ln_2/ln_ff
    silu_t = temb * jax.nn.sigmoid(temb)                      # SiLU in f32
    emb = jnp.dot(silu_t, wmod_ref[...],
                  preferred_element_type=jnp.float32) + bmod_ref[...]   # (Bt, 6D)

    def modulated_ln(v, shift, scale):
        # LayerNorm (no affine, eps=1e-6) * (1 + scale) + shift, all f32 on the VPU.
        mu = jnp.mean(v, axis=-1, keepdims=True)
        var = jnp.mean(jnp.square(v - mu), axis=-1, keepdims=True)
        vn = (v - mu) * jax.lax.rsqrt(var + 1e-6)
        return vn * (1.0 + scale[:, None, :]) + shift[:, None, :]

    nlat = modulated_ln(lat, emb[:, 0 * D:1 * D], emb[:, 1 * D:2 * D])   # ln_1(latents)
    nx = modulated_ln(x, emb[:, 2 * D:3 * D], emb[:, 3 * D:4 * D])       # ln_2(x)

    # ---- QKV projections on flattened (Bt*L, D) operands, bf16 operands on the MXU.
    # double_kv=True: kv = [normed_latents; normed_x].  Instead of a sublane concat,
    # project the two pieces separately and merge at the softmax.
    wqkv = wqkv_ref[...]                  # bf16 (D, 3D)
    bqkv = bqkv_ref[...]                  # f32  (1, 3D)
    qkv_l = jnp.dot(nlat.astype(jnp.bfloat16).reshape(Bt * Lq, D), wqkv,
                    preferred_element_type=jnp.float32) + bqkv            # (Bt*Lq, 3D)
    kv_x = jnp.dot(nx.astype(jnp.bfloat16).reshape(Bt * Lx, D), wqkv[:, D:],
                   preferred_element_type=jnp.float32) + bqkv[:, D:]      # (Bt*Lx, 2D)
    qkv_l = qkv_l.reshape(Bt, Lq, 3 * D)
    kv_x = kv_x.reshape(Bt, Lx, 2 * D)

    inv_sqrt_hd = 1.0 / float(hd) ** 0.5
    q = (qkv_l[:, :, :D] * inv_sqrt_hd).astype(jnp.bfloat16)   # (Bt, Lq, D)
    k_l = qkv_l[:, :, D:2 * D].astype(jnp.bfloat16)
    v_l = qkv_l[:, :, 2 * D:].astype(jnp.bfloat16)
    k_x = kv_x[:, :, :D].astype(jnp.bfloat16)
    v_x = kv_x[:, :, D:].astype(jnp.bfloat16)

    # ---- multi-head attention, batched over Bt; each head's output goes straight
    # into the VMEM scratch at its lane offset (no per-head concat).
    for h in range(H):
        sl = slice(h * hd, (h + 1) * hd)
        qh = q[:, :, sl]                                                   # (Bt, Lq, hd)
        s_l = jnp.einsum('bqd,bkd->bqk', qh, k_l[:, :, sl],
                         preferred_element_type=jnp.float32)               # (Bt, Lq, Lq)
        s_x = jnp.einsum('bqd,bkd->bqk', qh, k_x[:, :, sl],
                         preferred_element_type=jnp.float32)               # (Bt, Lq, Lx)
        m = jnp.maximum(jnp.max(s_l, axis=-1, keepdims=True),
                        jnp.max(s_x, axis=-1, keepdims=True))
        p_l = jnp.exp(s_l - m)
        p_x = jnp.exp(s_x - m)
        denom = (jnp.sum(p_l, axis=-1, keepdims=True)
                 + jnp.sum(p_x, axis=-1, keepdims=True))
        o_h = (jnp.einsum('bqk,bkd->bqd', p_l.astype(jnp.bfloat16), v_l[:, :, sl],
                          preferred_element_type=jnp.float32)
               + jnp.einsum('bqk,bkd->bqd', p_x.astype(jnp.bfloat16), v_x[:, :, sl],
                            preferred_element_type=jnp.float32))
        attn_scr[:, :, sl] = o_h * pl.reciprocal(denom, approx=True)

    attn = jnp.dot(attn_scr[...].astype(jnp.bfloat16).reshape(Bt * Lq, D), wo_ref[...],
                   preferred_element_type=jnp.float32) + bo_ref[...]
    # TODO(synk): key_padding_mask (attn_mask) branch not implemented; forward uses attn_mask=None.
    latents_new = lat + attn.reshape(Bt, Lq, D)

    # ---- MLP: c_fc -> SquaredReLU -> c_proj on ln_ff(latents), flattened M dim.
    ff_in = modulated_ln(latents_new, emb[:, 4 * D:5 * D], emb[:, 5 * D:6 * D])
    h1 = jnp.dot(ff_in.astype(jnp.bfloat16).reshape(Bt * Lq, D), wfc_ref[...],
                 preferred_element_type=jnp.float32) + bfc_ref[...]
    h1 = jnp.square(jnp.maximum(h1, 0.0))                      # SquaredReLU in f32
    mlp = jnp.dot(h1.astype(jnp.bfloat16), wpr_ref[...],
                  preferred_element_type=jnp.float32) + bpr_ref[...]

    out_ref[...] = (latents_new + mlp.reshape(Bt, Lq, D)).astype(out_ref.dtype)


def _full_spec(a):
    nd = a.ndim
    return pl.BlockSpec(a.shape, lambda *_: (0,) * nd)


def _pick_batch_block(B, Lq):
    # Fold batches into the matmul M dimension: aim for ~256 rows per grid step
    # (good for the 256-wide MXUs on v6e/v7x; also fine on v5e's 128-wide MXU).
    target = max(1, 256 // max(Lq, 8))
    bb = 1
    for cand in range(1, B + 1):
        if B % cand == 0 and cand <= target:
            bb = cand
    return bb


def perceiver_attention_block(x, latents, temb, params, n_heads, block_b=None):
    B, Lx, D = x.shape
    _, Lq, _ = latents.shape
    T = temb.shape[-1]
    assert D % n_heads == 0

    if block_b is None:
        block_b = _pick_batch_block(B, Lq)
    assert B % block_b == 0

    # Fuse the three AdaLayerNorm modulation linears into one (T, 6D) matmul (kept f32).
    w_mod = jnp.concatenate([params["w1"], params["w2"], params["wff"]], axis=1)
    b_mod = jnp.concatenate([params["b1"], params["b2"], params["bff"]], axis=1)

    # bf16 weights for the MXU (f32 accumulation in-kernel); biases stay f32.
    # (For very large D on v7x, wfc/wpr could additionally be kept in HBM and
    #  pipelined over the 4D inner dim; unnecessary at these sizes.)
    weights = [
        w_mod, b_mod,
        params["wqkv"].astype(jnp.bfloat16), params["bqkv"],
        params["wo"].astype(jnp.bfloat16), params["bo"],
        params["wfc"].astype(jnp.bfloat16), params["bfc"],
        params["wpr"].astype(jnp.bfloat16), params["bpr"],
    ]

    in_specs = [
        pl.BlockSpec((block_b, Lx, D), lambda i: (i, 0, 0)),   # x
        pl.BlockSpec((block_b, Lq, D), lambda i: (i, 0, 0)),   # latents
        pl.BlockSpec((block_b, T), lambda i: (i, 0)),          # timestep embedding
    ] + [_full_spec(w) for w in weights]

    kernel = functools.partial(_perceiver_block_kernel, n_heads)
    return pl.pallas_call(
        kernel,
        out_shape=jax.ShapeDtypeStruct((B, Lq, D), x.dtype),
        grid=(B // block_b,),
        in_specs=in_specs,
        out_specs=pl.BlockSpec((block_b, Lq, D), lambda i: (i, 0, 0)),
        scratch_shapes=[pltpu.VMEM((block_b, Lq, D), jnp.float32)],
        compiler_params=pltpu.CompilerParams(
            dimension_semantics=("parallel",),
            vmem_limit_bytes=32 * 1024 * 1024),
    )(x, latents, temb, *weights)


def reference(x, latents, temb, p, n_heads):
    """Pure-JAX f32 reference matching the PyTorch forward semantics."""
    D = x.shape[-1]
    hd = D // n_heads
    silu_t = temb * jax.nn.sigmoid(temb)

    def ada_ln(v, w, b_):
        emb = silu_t @ w + b_                            # (B, 2D)
        shift = emb[:, None, :D]
        scale = emb[:, None, D:]
        mu = jnp.mean(v, axis=-1, keepdims=True)
        var = jnp.mean(jnp.square(v - mu), axis=-1, keepdims=True)
        vn = (v - mu) / jnp.sqrt(var + 1e-6)
        return vn * (1.0 + scale) + shift

    nlat = ada_ln(latents, p["w1"], p["b1"])
    nx = ada_ln(x, p["w2"], p["b2"])
    kv = jnp.concatenate([nlat, nx], axis=1)

    q = nlat @ p["wqkv"][:, :D] + p["bqkv"][:, :D]
    k = kv @ p["wqkv"][:, D:2 * D] + p["bqkv"][:, D:2 * D]
    v = kv @ p["wqkv"][:, 2 * D:] + p["bqkv"][:, 2 * D:]

    B, Lq, _ = q.shape
    Lkv = k.shape[1]
    qh = q.reshape(B, Lq, n_heads, hd).transpose(0, 2, 1, 3)
    kh = k.reshape(B, Lkv, n_heads, hd).transpose(0, 2, 1, 3)
    vh = v.reshape(B, Lkv, n_heads, hd).transpose(0, 2, 1, 3)
    s = jnp.einsum("bhqd,bhkd->bhqk", qh, kh) / jnp.sqrt(float(hd))
    pr = jax.nn.softmax(s, axis=-1)
    o = jnp.einsum("bhqk,bhkd->bhqd", pr, vh).transpose(0, 2, 1, 3).reshape(B, Lq, D)
    attn = o @ p["wo"] + p["bo"]

    lat2 = latents + attn
    ff_in = ada_ln(lat2, p["wff"], p["bff"])
    h1 = ff_in @ p["wfc"] + p["bfc"]
    h1 = jnp.square(jnp.maximum(h1, 0.0))
    return lat2 + h1 @ p["wpr"] + p["bpr"]


def init_params(key, d_model, n_heads, t_dim):
    keys = jax.random.split(key, 14)
    s = 0.02

    def w(k, shape):
        return (s * jax.random.normal(k, shape)).astype(jnp.float32)

    params = {
        # AdaLayerNorm linears (t_dim -> 2*d_model).  (The module zero-inits them;
        # small random values so the modulation path is actually exercised.)
        "w1": w(keys[0], (t_dim, 2 * d_model)), "b1": w(keys[1], (1, 2 * d_model)),
        "w2": w(keys[2], (t_dim, 2 * d_model)), "b2": w(keys[3], (1, 2 * d_model)),
        "wff": w(keys[4], (t_dim, 2 * d_model)), "bff": w(keys[5], (1, 2 * d_model)),
        # MultiheadAttention in_proj (D -> 3D) and out_proj (D -> D)
        "wqkv": w(keys[6], (d_model, 3 * d_model)), "bqkv": w(keys[7], (1, 3 * d_model)),
        "wo": w(keys[8], (d_model, d_model)), "bo": w(keys[9], (1, d_model)),
        # MLP: c_fc (D -> 4D), c_proj (4D -> D)
        "wfc": w(keys[10], (d_model, 4 * d_model)), "bfc": w(keys[11], (1, 4 * d_model)),
        "wpr": w(keys[12], (4 * d_model, d_model)), "bpr": w(keys[13], (1, d_model)),
    }
    return params


if __name__ == "__main__":
    B, Lq, Lx = 2, 8, 16
    d_model, n_heads = 32, 4
    t_dim = d_model  # time_embedding_dim=None -> d_model

    key = jax.random.PRNGKey(0)
    kx, kl, kt, kp = jax.random.split(key, 4)
    x = jax.random.normal(kx, (B, Lx, d_model), dtype=jnp.float32)
    latents = jax.random.normal(kl, (B, Lq, d_model), dtype=jnp.float32)
    temb = jax.random.normal(kt, (B, t_dim), dtype=jnp.float32)
    params = init_params(kp, d_model, n_heads, t_dim)

    out = perceiver_attention_block(x, latents, temb, params, n_heads)
    out = jax.block_until_ready(out)

    ref = jax.block_until_ready(reference(x, latents, temb, params, n_heads))
    # bf16 MXU operands with f32 accumulation -> loosened tolerance vs f32 reference.
    np.testing.assert_allclose(np.asarray(out), np.asarray(ref), rtol=2e-2, atol=2e-2)

    print("KERNEL_OK")
</pallas_src>

<mosaic_0001>
module attributes {stable_mosaic.version = 11 : i64} {
  func.func @_perceiver_block_kernel(%arg0: i32, %arg1: memref<2x16x32xf32, #tpu.memory_space<vmem>>, %arg2: memref<2x8x32xf32, #tpu.memory_space<vmem>>, %arg3: memref<2x32xf32, #tpu.memory_space<vmem>>, %arg4: memref<32x192xf32, #tpu.memory_space<vmem>>, %arg5: memref<1x192xf32, #tpu.memory_space<vmem>>, %arg6: memref<32x96xbf16, #tpu.memory_space<vmem>>, %arg7: memref<1x96xf32, #tpu.memory_space<vmem>>, %arg8: memref<32x32xbf16, #tpu.memory_space<vmem>>, %arg9: memref<1x32xf32, #tpu.memory_space<vmem>>, %arg10: memref<32x128xbf16, #tpu.memory_space<vmem>>, %arg11: memref<1x128xf32, #tpu.memory_space<vmem>>, %arg12: memref<128x32xbf16, #tpu.memory_space<vmem>>, %arg13: memref<1x32xf32, #tpu.memory_space<vmem>>, %arg14: memref<2x8x32xf32, #tpu.memory_space<vmem>>, %arg15: memref<2x8x32xf32, #tpu.memory_space<vmem>>) attributes {dimension_semantics = [#tpu.dimension_semantics<parallel>], iteration_bounds = array<i64: 1>, scalar_prefetch = 0 : i64, scratch_operands = 1 : i64, tpu.core_type = #tpu.core_type<tc>, window_params = [{transform_indices = @transform_0, window_bounds = array<i64: 2, 16, 32>}, {transform_indices = @transform_1, window_bounds = array<i64: 2, 8, 32>}, {transform_indices = @transform_2, window_bounds = array<i64: 2, 32>}, {pipeline_mode = #tpu.pipeline_mode<synchronous>, transform_indices = @transform_3, window_bounds = array<i64: 32, 192>}, {pipeline_mode = #tpu.pipeline_mode<synchronous>, transform_indices = @transform_4, window_bounds = array<i64: 1, 192>}, {pipeline_mode = #tpu.pipeline_mode<synchronous>, transform_indices = @transform_5, window_bounds = array<i64: 32, 96>}, {pipeline_mode = #tpu.pipeline_mode<synchronous>, transform_indices = @transform_6, window_bounds = array<i64: 1, 96>}, {pipeline_mode = #tpu.pipeline_mode<synchronous>, transform_indices = @transform_7, window_bounds = array<i64: 32, 32>}, {pipeline_mode = #tpu.pipeline_mode<synchronous>, transform_indices = @transform_8, window_bounds = array<i64: 1, 32>}, {pipeline_mode = #tpu.pipeline_mode<synchronous>, transform_indices = @transform_9, window_bounds = array<i64: 32, 128>}, {pipeline_mode = #tpu.pipeline_mode<synchronous>, transform_indices = @transform_10, window_bounds = array<i64: 1, 128>}, {pipeline_mode = #tpu.pipeline_mode<synchronous>, transform_indices = @transform_11, window_bounds = array<i64: 128, 32>}, {pipeline_mode = #tpu.pipeline_mode<synchronous>, transform_indices = @transform_12, window_bounds = array<i64: 1, 32>}, {transform_indices = @transform_13, window_bounds = array<i64: 2, 8, 32>}]} {
    %c0 = arith.constant 0 : index
    %c0_0 = arith.constant 0 : index
    %c0_1 = arith.constant 0 : index
    %0 = vector.load %arg2[%c0, %c0_0, %c0_1] : memref<2x8x32xf32, #tpu.memory_space<vmem>>, vector<2x8x32xf32>
    %c0_2 = arith.constant 0 : index
    %c0_3 = arith.constant 0 : index
    %c0_4 = arith.constant 0 : index
    %1 = vector.load %arg1[%c0_2, %c0_3, %c0_4] : memref<2x16x32xf32, #tpu.memory_space<vmem>>, vector<2x16x32xf32>
    %c0_5 = arith.constant 0 : index
    %c0_6 = arith.constant 0 : index
    %2 = vector.load %arg3[%c0_5, %c0_6] : memref<2x32xf32, #tpu.memory_space<vmem>>, vector<2x32xf32>
    %3 = arith.negf %2 : vector<2x32xf32>
    %4 = math.exp %3 : vector<2x32xf32>
    %cst = arith.constant 1.000000e+00 : f32
    %5 = vector.broadcast %cst : f32 to vector<2x32xf32>
    %6 = arith.addf %5, %4 : vector<2x32xf32>
    %7 = arith.divf %5, %6 : vector<2x32xf32>
    %8 = arith.mulf %2, %7 : vector<2x32xf32>
    %c0_7 = arith.constant 0 : index
    %c0_8 = arith.constant 0 : index
    %9 = vector.load %arg4[%c0_7, %c0_8] : memref<32x192xf32, #tpu.memory_space<vmem>>, vector<32x192xf32>
    %cst_9 = arith.constant dense<0.000000e+00> : vector<2x192xf32>
    %10 = tpu.matmul %8, %9, %cst_9 {dimension_numbers = #tpu.dot_dimension_numbers<[1], [0], [0], [1], [0, 0, 1, 1], [], []>} : vector<2x32xf32>, vector<32x192xf32>, vector<2x192xf32> -> vector<2x192xf32>
    %c0_10 = arith.constant 0 : index
    %c0_11 = arith.constant 0 : index
    %11 = vector.load %arg5[%c0_10, %c0_11] : memref<1x192xf32, #tpu.memory_space<vmem>>, vector<1x192xf32>
    %12 = vector.broadcast %11 : vector<1x192xf32> to vector<2x192xf32>
    %13 = arith.addf %10, %12 : vector<2x192xf32>
    %14 = vector.extract_strided_slice %13 {offsets = [0, 0], sizes = [2, 32], strides = [1, 1]} : vector<2x192xf32> to vector<2x32xf32>
    %15 = vector.extract_strided_slice %13 {offsets = [0, 32], sizes = [2, 32], strides = [1, 1]} : vector<2x192xf32> to vector<2x32xf32>
    %cst_12 = arith.constant dense<0.000000e+00> : vector<2x8xf32>
    %16 = vector.multi_reduction <add>, %0, %cst_12 [2] : vector<2x8x32xf32> to vector<2x8xf32>
    %17 = vector.shape_cast %16 : vector<2x8xf32> to vector<2x8x1xf32>
    %cst_13 = arith.constant 3.200000e+01 : f32
    %18 = vector.broadcast %cst_13 : f32 to vector<2x8x1xf32>
    %19 = arith.divf %17, %18 : vector<2x8x1xf32>
    %20 = vector.broadcast %19 : vector<2x8x1xf32> to vector<2x8x32xf32>
    %21 = arith.subf %0, %20 : vector<2x8x32xf32>
    %22 = arith.mulf %21, %21 : vector<2x8x32xf32>
    %cst_14 = arith.constant dense<0.000000e+00> : vector<2x8xf32>
    %23 = vector.multi_reduction <add>, %22, %cst_14 [2] : vector<2x8x32xf32> to vector<2x8xf32>
    %24 = vector.shape_cast %23 : vector<2x8xf32> to vector<2x8x1xf32>
    %cst_15 = arith.constant 3.200000e+01 : f32
    %25 = vector.broadcast %cst_15 : f32 to vector<2x8x1xf32>
    %26 = arith.divf %24, %25 : vector<2x8x1xf32>
    %27 = vector.broadcast %19 : vector<2x8x1xf32> to vector<2x8x32xf32>
    %28 = arith.subf %0, %27 : vector<2x8x32xf32>
    %cst_16 = arith.constant 9.99999997E-7 : f32
    %29 = vector.broadcast %cst_16 : f32 to vector<2x8x1xf32>
    %30 = arith.addf %26, %29 : vector<2x8x1xf32>
    %31 = math.rsqrt %30 : vector<2x8x1xf32>
    %32 = vector.broadcast %31 : vector<2x8x1xf32> to vector<2x8x32xf32>
    %33 = arith.mulf %28, %32 : vector<2x8x32xf32>
    %34 = vector.shape_cast %15 : vector<2x32xf32> to vector<2x1x32xf32>
    %cst_17 = arith.constant 1.000000e+00 : f32
    %35 = vector.broadcast %cst_17 : f32 to vector<2x1x32xf32>
    %36 = arith.addf %35, %34 : vector<2x1x32xf32>
    %37 = vector.broadcast %36 : vector<2x1x32xf32> to vector<2x8x32xf32>
    %38 = arith.mulf %33, %37 : vector<2x8x32xf32>
    %39 = vector.shape_cast %14 : vector<2x32xf32> to vector<2x1x32xf32>
    %40 = vector.broadcast %39 : vector<2x1x32xf32> to vector<2x8x32xf32>
    %41 = arith.addf %38, %40 : vector<2x8x32xf32>
    %42 = vector.extract_strided_slice %13 {offsets = [0, 64], sizes = [2, 32], strides = [1, 1]} : vector<2x192xf32> to vector<2x32xf32>
    %43 = vector.extract_strided_slice %13 {offsets = [0, 96], sizes = [2, 32], strides = [1, 1]} : vector<2x192xf32> to vector<2x32xf32>
    %cst_18 = arith.constant dense<0.000000e+00> : vector<2x16xf32>
    %44 = vector.multi_reduction <add>, %1, %cst_18 [2] : vector<2x16x32xf32> to vector<2x16xf32>
    %45 = vector.shape_cast %44 : vector<2x16xf32> to vector<2x16x1xf32>
    %cst_19 = arith.constant 3.200000e+01 : f32
    %46 = vector.broadcast %cst_19 : f32 to vector<2x16x1xf32>
    %47 = arith.divf %45, %46 : vector<2x16x1xf32>
    %48 = vector.broadcast %47 : vector<2x16x1xf32> to vector<2x16x32xf32>
    %49 = arith.subf %1, %48 : vector<2x16x32xf32>
    %50 = arith.mulf %49, %49 : vector<2x16x32xf32>
    %cst_20 = arith.constant dense<0.000000e+00> : vector<2x16xf32>
    %51 = vector.multi_reduction <add>, %50, %cst_20 [2] : vector<2x16x32xf32> to vector<2x16xf32>
    %52 = vector.shape_cast %51 : vector<2x16xf32> to vector<2x16x1xf32>
    %cst_21 = arith.constant 3.200000e+01 : f32
    %53 = vector.broadcast %cst_21 : f32 to vector<2x16x1xf32>
    %54 = arith.divf %52, %53 : vector<2x16x1xf32>
    %55 = vector.broadcast %47 : vector<2x16x1xf32> to vector<2x16x32xf32>
    %56 = arith.subf %1, %55 : vector<2x16x32xf32>
    %cst_22 = arith.constant 9.99999997E-7 : f32
    %57 = vector.broadcast %cst_22 : f32 to vector<2x16x1xf32>
    %58 = arith.addf %54, %57 : vector<2x16x1xf32>
    %59 = math.rsqrt %58 : vector<2x16x1xf32>
    %60 = vector.broadcast %59 : vector<2x16x1xf32> to vector<2x16x32xf32>
    %61 = arith.mulf %56, %60 : vector<2x16x32xf32>
    %62 = vector.shape_cast %43 : vector<2x32xf32> to vector<2x1x32xf32>
    %cst_23 = arith.constant 1.000000e+00 : f32
    %63 = vector.broadcast %cst_23 : f32 to vector<2x1x32xf32>
    %64 = arith.addf %63, %62 : vector<2x1x32xf32>
    %65 = vector.broadcast %64 : vector<2x1x32xf32> to vector<2x16x32xf32>
    %66 = arith.mulf %61, %65 : vector<2x16x32xf32>
    %67 = vector.shape_cast %42 : vector<2x32xf32> to vector<2x1x32xf32>
    %68 = vector.broadcast %67 : vector<2x1x32xf32> to vector<2x16x32xf32>
    %69 = arith.addf %66, %68 : vector<2x16x32xf32>
    %c0_24 = arith.constant 0 : index
    %c0_25 = arith.constant 0 : index
    %70 = vector.load %arg6[%c0_24, %c0_25] : memref<32x96xbf16, #tpu.memory_space<vmem>>, vector<32x96xbf16>
    %c0_26 = arith.constant 0 : index
    %c0_27 = arith.constant 0 : index
    %71 = vector.load %arg7[%c0_26, %c0_27] : memref<1x96xf32, #tpu.memory_space<vmem>>, vector<1x96xf32>
    %72 = arith.truncf %41 : vector<2x8x32xf32> to vector<2x8x32xbf16>
    %73 = vector.shape_cast %72 : vector<2x8x32xbf16> to vector<16x32xbf16>
    %cst_28 = arith.constant dense<0.000000e+00> : vector<16x96xf32>
    %74 = tpu.matmul %73, %70, %cst_28 {dimension_numbers = #tpu.dot_dimension_numbers<[1], [0], [0], [1], [0, 0, 1, 1], [], []>} : vector<16x32xbf16>, vector<32x96xbf16>, vector<16x96xf32> -> vector<16x96xf32>
    %75 = vector.broadcast %71 : vector<1x96xf32> to vector<16x96xf32>
    %76 = arith.addf %74, %75 : vector<16x96xf32>
    %77 = arith.truncf %69 : vector<2x16x32xf32> to vector<2x16x32xbf16>
    %78 = vector.shape_cast %77 : vector<2x16x32xbf16> to vector<32x32xbf16>
    %79 = vector.extract_strided_slice %70 {offsets = [0, 32], sizes = [32, 64], strides = [1, 1]} : vector<32x96xbf16> to vector<32x64xbf16>
    %cst_29 = arith.constant dense<0.000000e+00> : vector<32x64xf32>
    %80 = tpu.matmul %78, %79, %cst_29 {dimension_numbers = #tpu.dot_dimension_numbers<[1], [0], [0], [1], [0, 0, 1, 1], [], []>} : vector<32x32xbf16>, vector<32x64xbf16>, vector<32x64xf32> -> vector<32x64xf32>
    %81 = vector.extract_strided_slice %71 {offsets = [0, 32], sizes = [1, 64], strides = [1, 1]} : vector<1x96xf32> to vector<1x64xf32>
    %82 = vector.broadcast %81 : vector<1x64xf32> to vector<32x64xf32>
    %83 = arith.addf %80, %82 : vector<32x64xf32>
    %84 = vector.shape_cast %76 : vector<16x96xf32> to vector<2x8x96xf32>
    %85 = vector.shape_cast %83 : vector<32x64xf32> to vector<2x16x64xf32>
    %86 = vector.extract_strided_slice %84 {offsets = [0, 0, 0], sizes = [2, 8, 32], strides = [1, 1, 1]} : vector<2x8x96xf32> to vector<2x8x32xf32>
    %cst_30 = arith.constant 0.353553385 : f32
    %87 = vector.broadcast %cst_30 : f32 to vector<2x8x32xf32>
    %88 = arith.mulf %86, %87 : vector<2x8x32xf32>
    %89 = arith.truncf %88 : vector<2x8x32xf32> to vector<2x8x32xbf16>
    %90 = vector.extract_strided_slice %84 {offsets = [0, 0, 32], sizes = [2, 8, 32], strides = [1, 1, 1]} : vector<2x8x96xf32> to vector<2x8x32xf32>
    %91 = arith.truncf %90 : vector<2x8x32xf32> to vector<2x8x32xbf16>
    %92 = vector.extract_strided_slice %84 {offsets = [0, 0, 64], sizes = [2, 8, 32], strides = [1, 1, 1]} : vector<2x8x96xf32> to vector<2x8x32xf32>
    %93 = arith.truncf %92 : vector<2x8x32xf32> to vector<2x8x32xbf16>
    %94 = vector.extract_strided_slice %85 {offsets = [0, 0, 0], sizes = [2, 16, 32], strides = [1, 1, 1]} : vector<2x16x64xf32> to vector<2x16x32xf32>
    %95 = arith.truncf %94 : vector<2x16x32xf32> to vector<2x16x32xbf16>
    %96 = vector.extract_strided_slice %85 {offsets = [0, 0, 32], sizes = [2, 16, 32], strides = [1, 1, 1]} : vector<2x16x64xf32> to vector<2x16x32xf32>
    %97 = arith.truncf %96 : vector<2x16x32xf32> to vector<2x16x32xbf16>
    %98 = vector.extract_strided_slice %89 {offsets = [0, 0, 0], sizes = [2, 8, 8], strides = [1, 1, 1]} : vector<2x8x32xbf16> to vector<2x8x8xbf16>
    %99 = vector.extract_strided_slice %91 {offsets = [0, 0, 0], sizes = [2, 8, 8], strides = [1, 1, 1]} : vector<2x8x32xbf16> to vector<2x8x8xbf16>
    "tpu.trace_start"() <{level = 10 : i32, message = "bqd,bkd->bqk"}> : () -> ()
    %cst_31 = arith.constant dense<0.000000e+00> : vector<2x8x8xf32>
    %100 = tpu.matmul %98, %99, %cst_31 {dimension_numbers = #tpu.dot_dimension_numbers<[2], [2], [1], [1], [0, 0, 0, 1, 1, 1], [0], [0]>} : vector<2x8x8xbf16>, vector<2x8x8xbf16>, vector<2x8x8xf32> -> vector<2x8x8xf32>
    "tpu.trace_stop"() : () -> ()
    %101 = vector.extract_strided_slice %95 {offsets = [0, 0, 0], sizes = [2, 16, 8], strides = [1, 1, 1]} : vector<2x16x32xbf16> to vector<2x16x8xbf16>
    "tpu.trace_start"() <{level = 10 : i32, message = "bqd,bkd->bqk"}> : () -> ()
    %cst_32 = arith.constant dense<0.000000e+00> : vector<2x8x16xf32>
    %102 = tpu.matmul %98, %101, %cst_32 {dimension_numbers = #tpu.dot_dimension_numbers<[2], [2], [1], [1], [0, 0, 0, 1, 1, 1], [0], [0]>} : vector<2x8x8xbf16>, vector<2x16x8xbf16>, vector<2x8x16xf32> -> vector<2x8x16xf32>
    "tpu.trace_stop"() : () -> ()
    %cst_33 = arith.constant dense<0xFF800000> : vector<2x8xf32>
    %103 = vector.multi_reduction <maximumf>, %100, %cst_33 [2] : vector<2x8x8xf32> to vector<2x8xf32>
    %104 = vector.shape_cast %103 : vector<2x8xf32> to vector<2x8x1xf32>
    %cst_34 = arith.constant dense<0xFF800000> : vector<2x8xf32>
    %105 = vector.multi_reduction <maximumf>, %102, %cst_34 [2] : vector<2x8x16xf32> to vector<2x8xf32>
    %106 = vector.shape_cast %105 : vector<2x8xf32> to vector<2x8x1xf32>
    %107 = arith.maximumf %104, %106 : vector<2x8x1xf32>
    %108 = vector.broadcast %107 : vector<2x8x1xf32> to vector<2x8x8xf32>
    %109 = arith.subf %100, %108 : vector<2x8x8xf32>
    %110 = math.exp %109 : vector<2x8x8xf32>
    %111 = vector.broadcast %107 : vector<2x8x1xf32> to vector<2x8x16xf32>
    %112 = arith.subf %102, %111 : vector<2x8x16xf32>
    %113 = math.exp %112 : vector<2x8x16xf32>
    %cst_35 = arith.constant dense<0.000000e+00> : vector<2x8xf32>
    %114 = vector.multi_reduction <add>, %110, %cst_35 [2] : vector<2x8x8xf32> to vector<2x8xf32>
    %115 = vector.shape_cast %114 : vector<2x8xf32> to vector<2x8x1xf32>
    %cst_36 = arith.constant dense<0.000000e+00> : vector<2x8xf32>
    %116 = vector.multi_reduction <add>, %113, %cst_36 [2] : vector<2x8x16xf32> to vector<2x8xf32>
    %117 = vector.shape_cast %116 : vector<2x8xf32> to vector<2x8x1xf32>
    %118 = arith.addf %115, %117 : vector<2x8x1xf32>
    %119 = arith.truncf %110 : vector<2x8x8xf32> to vector<2x8x8xbf16>
    %120 = vector.extract_strided_slice %93 {offsets = [0, 0, 0], sizes = [2, 8, 8], strides = [1, 1, 1]} : vector<2x8x32xbf16> to vector<2x8x8xbf16>
    "tpu.trace_start"() <{level = 10 : i32, message = "bqk,bkd->bqd"}> : () -> ()
    %cst_37 = arith.constant dense<0.000000e+00> : vector<2x8x8xf32>
    %121 = tpu.matmul %119, %120, %cst_37 {dimension_numbers = #tpu.dot_dimension_numbers<[2], [1], [1], [2], [0, 0, 0, 1, 1, 2], [0], [0]>} : vector<2x8x8xbf16>, vector<2x8x8xbf16>, vector<2x8x8xf32> -> vector<2x8x8xf32>
    "tpu.trace_stop"() : () -> ()
    %122 = arith.truncf %113 : vector<2x8x16xf32> to vector<2x8x16xbf16>
    %123 = vector.extract_strided_slice %97 {offsets = [0, 0, 0], sizes = [2, 16, 8], strides = [1, 1, 1]} : vector<2x16x32xbf16> to vector<2x16x8xbf16>
    "tpu.trace_start"() <{level = 10 : i32, message = "bqk,bkd->bqd"}> : () -> ()
    %cst_38 = arith.constant dense<0.000000e+00> : vector<2x8x8xf32>
    %124 = tpu.matmul %122, %123, %cst_38 {dimension_numbers = #tpu.dot_dimension_numbers<[2], [1], [1], [2], [0, 0, 0, 1, 1, 2], [0], [0]>} : vector<2x8x16xbf16>, vector<2x16x8xbf16>, vector<2x8x8xf32> -> vector<2x8x8xf32>
    "tpu.trace_stop"() : () -> ()
    %125 = arith.addf %121, %124 : vector<2x8x8xf32>
    %126 = tpu.reciprocal %118 {approx = true} : vector<2x8x1xf32> -> vector<2x8x1xf32>
    %127 = vector.broadcast %126 : vector<2x8x1xf32> to vector<2x8x8xf32>
    %128 = arith.mulf %125, %127 : vector<2x8x8xf32>
    %c0_39 = arith.constant 0 : index
    %c0_40 = arith.constant 0 : index
    %c0_41 = arith.constant 0 : index
    %129 = vector.load %arg15[%c0_39, %c0_40, %c0_41] : memref<2x8x32xf32, #tpu.memory_space<vmem>>, vector<2x8x8xf32>
    tpu.vector_store %arg15[%c0_39, %c0_40, %c0_41], %128 {strides = array<i32>} : memref<2x8x32xf32, #tpu.memory_space<vmem>>, vector<2x8x8xf32>,
    %130 = vector.extract_strided_slice %89 {offsets = [0, 0, 8], sizes = [2, 8, 8], strides = [1, 1, 1]} : vector<2x8x32xbf16> to vector<2x8x8xbf16>
    %131 = vector.extract_strided_slice %91 {offsets = [0, 0, 8], sizes = [2, 8, 8], strides = [1, 1, 1]} : vector<2x8x32xbf16> to vector<2x8x8xbf16>
    "tpu.trace_start"() <{level = 10 : i32, message = "bqd,bkd->bqk"}> : () -> ()
    %cst_42 = arith.constant dense<0.000000e+00> : vector<2x8x8xf32>
    %132 = tpu.matmul %130, %131, %cst_42 {dimension_numbers = #tpu.dot_dimension_numbers<[2], [2], [1], [1], [0, 0, 0, 1, 1, 1], [0], [0]>} : vector<2x8x8xbf16>, vector<2x8x8xbf16>, vector<2x8x8xf32> -> vector<2x8x8xf32>
    "tpu.trace_stop"() : () -> ()
    %133 = vector.extract_strided_slice %95 {offsets = [0, 0, 8], sizes = [2, 16, 8], strides = [1, 1, 1]} : vector<2x16x32xbf16> to vector<2x16x8xbf16>
    "tpu.trace_start"() <{level = 10 : i32, message = "bqd,bkd->bqk"}> : () -> ()
    %cst_43 = arith.constant dense<0.000000e+00> : vector<2x8x16xf32>
    %134 = tpu.matmul %130, %133, %cst_43 {dimension_numbers = #tpu.dot_dimension_numbers<[2], [2], [1], [1], [0, 0, 0, 1, 1, 1], [0], [0]>} : vector<2x8x8xbf16>, vector<2x16x8xbf16>, vector<2x8x16xf32> -> vector<2x8x16xf32>
    "tpu.trace_stop"() : () -> ()
    %cst_44 = arith.constant dense<0xFF800000> : vector<2x8xf32>
    %135 = vector.multi_reduction <maximumf>, %132, %cst_44 [2] : vector<2x8x8xf32> to vector<2x8xf32>
    %136 = vector.shape_cast %135 : vector<2x8xf32> to vector<2x8x1xf32>
    %cst_45 = arith.constant dense<0xFF800000> : vector<2x8xf32>
    %137 = vector.multi_reduction <maximumf>, %134, %cst_45 [2] : vector<2x8x16xf32> to vector<2x8xf32>
    %138 = vector.shape_cast %137 : vector<2x8xf32> to vector<2x8x1xf32>
    %139 = arith.maximumf %136, %138 : vector<2x8x1xf32>
    %140 = vector.broadcast %139 : vector<2x8x1xf32> to vector<2x8x8xf32>
    %141 = arith.subf %132, %140 : vector<2x8x8xf32>
    %142 = math.exp %141 : vector<2x8x8xf32>
    %143 = vector.broadcast %139 : vector<2x8x1xf32> to vector<2x8x16xf32>
    %144 = arith.subf %134, %143 : vector<2x8x16xf32>
    %145 = math.exp %144 : vector<2x8x16xf32>
    %cst_46 = arith.constant dense<0.000000e+00> : vector<2x8xf32>
    %146 = vector.multi_reduction <add>, %142, %cst_46 [2] : vector<2x8x8xf32> to vector<2x8xf32>
    %147 = vector.shape_cast %146 : vector<2x8xf32> to vector<2x8x1xf32>
    %cst_47 = arith.constant dense<0.000000e+00> : vector<2x8xf32>
    %148 = vector.multi_reduction <add>, %145, %cst_47 [2] : vector<2x8x16xf32> to vector<2x8xf32>
    %149 = vector.shape_cast %148 : vector<2x8xf32> to vector<2x8x1xf32>
    %150 = arith.addf %147, %149 : vector<2x8x1xf32>
    %151 = arith.truncf %142 : vector<2x8x8xf32> to vector<2x8x8xbf16>
    %152 = vector.extract_strided_slice %93 {offsets = [0, 0, 8], sizes = [2, 8, 8], strides = [1, 1, 1]} : vector<2x8x32xbf16> to vector<2x8x8xbf16>
    "tpu.trace_start"() <{level = 10 : i32, message = "bqk,bkd->bqd"}> : () -> ()
    %cst_48 = arith.constant dense<0.000000e+00> : vector<2x8x8xf32>
    %153 = tpu.matmul %151, %152, %cst_48 {dimension_numbers = #tpu.dot_dimension_numbers<[2], [1], [1], [2], [0, 0, 0, 1, 1, 2], [0], [0]>} : vector<2x8x8xbf16>, vector<2x8x8xbf16>, vector<2x8x8xf32> -> vector<2x8x8xf32>
    "tpu.trace_stop"() : () -> ()
    %154 = arith.truncf %145 : vector<2x8x16xf32> to vector<2x8x16xbf16>
    %155 = vector.extract_strided_slice %97 {offsets = [0, 0, 8], sizes = [2, 16, 8], strides = [1, 1, 1]} : vector<2x16x32xbf16> to vector<2x16x8xbf16>
    "tpu.trace_start"() <{level = 10 : i32, message = "bqk,bkd->bqd"}> : () -> ()
    %cst_49 = arith.constant dense<0.000000e+00> : vector<2x8x8xf32>
    %156 = tpu.matmul %154, %155, %cst_49 {dimension_numbers = #tpu.dot_dimension_numbers<[2], [1], [1], [2], [0, 0, 0, 1, 1, 2], [0], [0]>} : vector<2x8x16xbf16>, vector<2x16x8xbf16>, vector<2x8x8xf32> -> vector<2x8x8xf32>
    "tpu.trace_stop"() : () -> ()
    %157 = arith.addf %153, %156 : vector<2x8x8xf32>
    %158 = tpu.reciprocal %150 {approx = true} : vector<2x8x1xf32> -> vector<2x8x1xf32>
    %159 = vector.broadcast %158 : vector<2x8x1xf32> to vector<2x8x8xf32>
    %160 = arith.mulf %157, %159 : vector<2x8x8xf32>
    %c0_50 = arith.constant 0 : index
    %c0_51 = arith.constant 0 : index
    %c8 = arith.constant 8 : index
    %161 = vector.load %arg15[%c0_50, %c0_51, %c8] : memref<2x8x32xf32, #tpu.memory_space<vmem>>, vector<2x8x8xf32>
    tpu.vector_store %arg15[%c0_50, %c0_51, %c8], %160 {strides = array<i32>} : memref<2x8x32xf32, #tpu.memory_space<vmem>>, vector<2x8x8xf32>,
    %162 = vector.extract_strided_slice %89 {offsets = [0, 0, 16], sizes = [2, 8, 8], strides = [1, 1, 1]} : vector<2x8x32xbf16> to vector<2x8x8xbf16>
    %163 = vector.extract_strided_slice %91 {offsets = [0, 0, 16], sizes = [2, 8, 8], strides = [1, 1, 1]} : vector<2x8x32xbf16> to vector<2x8x8xbf16>
    "tpu.trace_start"() <{level = 10 : i32, message = "bqd,bkd->bqk"}> : () -> ()
    %cst_52 = arith.constant dense<0.000000e+00> : vector<2x8x8xf32>
    %164 = tpu.matmul %162, %163, %cst_52 {dimension_numbers = #tpu.dot_dimension_numbers<[2], [2], [1], [1], [0, 0, 0, 1, 1, 1], [0], [0]>} : vector<2x8x8xbf16>, vector<2x8x8xbf16>, vector<2x8x8xf32> -> vector<2x8x8xf32>
    "tpu.trace_stop"() : () -> ()
    %165 = vector.extract_strided_slice %95 {offsets = [0, 0, 16], sizes = [2, 16, 8], strides = [1, 1, 1]} : vector<2x16x32xbf16> to vector<2x16x8xbf16>
    "tpu.trace_start"() <{level = 10 : i32, message = "bqd,bkd->bqk"}> : () -> ()
    %cst_53 = arith.constant dense<0.000000e+00> : vector<2x8x16xf32>
    %166 = tpu.matmul %162, %165, %cst_53 {dimension_numbers = #tpu.dot_dimension_numbers<[2], [2], [1], [1], [0, 0, 0, 1, 1, 1], [0], [0]>} : vector<2x8x8xbf16>, vector<2x16x8xbf16>, vector<2x8x16xf32> -> vector<2x8x16xf32>
    "tpu.trace_stop"() : () -> ()
    %cst_54 = arith.constant dense<0xFF800000> : vector<2x8xf32>
    %167 = vector.multi_reduction <maximumf>, %164, %cst_54 [2] : vector<2x8x8xf32> to vector<2x8xf32>
    %168 = vector.shape_cast %167 : vector<2x8xf32> to vector<2x8x1xf32>
    %cst_55 = arith.constant dense<0xFF800000> : vector<2x8xf32>
    %169 = vector.multi_reduction <maximumf>, %166, %cst_55 [2] : vector<2x8x16xf32> to vector<2x8xf32>
    %170 = vector.shape_cast %169 : vector<2x8xf32> to vector<2x8x1xf32>
    %171 = arith.maximumf %168, %170 : vector<2x8x1xf32>
    %172 = vector.broadcast %171 : vector<2x8x1xf32> to vector<2x8x8xf32>
    %173 = arith.subf %164, %172 : vector<2x8x8xf32>
    %174 = math.exp %173 : vector<2x8x8xf32>
    %175 = vector.broadcast %171 : vector<2x8x1xf32> to vector<2x8x16xf32>
    %176 = arith.subf %166, %175 : vector<2x8x16xf32>
    %177 = math.exp %176 : vector<2x8x16xf32>
    %cst_56 = arith.constant dense<0.000000e+00> : vector<2x8xf32>
    %178 = vector.multi_reduction <add>, %174, %cst_56 [2] : vector<2x8x8xf32> to vector<2x8xf32>
    %179 = vector.shape_cast %178 : vector<2x8xf32> to vector<2x8x1xf32>
    %cst_57 = arith.constant dense<0.000000e+00> : vector<2x8xf32>
    %180 = vector.multi_reduction <add>, %177, %cst_57 [2] : vector<2x8x16xf32> to vector<2x8xf32>
    %181 = vector.shape_cast %180 : vector<2x8xf32> to vector<2x8x1xf32>
    %182 = arith.addf %179, %181 : vector<2x8x1xf32>
    %183 = arith.truncf %174 : vector<2x8x8xf32> to vector<2x8x8xbf16>
    %184 = vector.extract_strided_slice %93 {offsets = [0, 0, 16], sizes = [2, 8, 8], strides = [1, 1, 1]} : vector<2x8x32xbf16> to vector<2x8x8xbf16>
    "tpu.trace_start"() <{level = 10 : i32, message = "bqk,bkd->bqd"}> : () -> ()
    %cst_58 = arith.constant dense<0.000000e+00> : vector<2x8x8xf32>
    %185 = tpu.matmul %183, %184, %cst_58 {dimension_numbers = #tpu.dot_dimension_numbers<[2], [1], [1], [2], [0, 0, 0, 1, 1, 2], [0], [0]>} : vector<2x8x8xbf16>, vector<2x8x8xbf16>, vector<2x8x8xf32> -> vector<2x8x8xf32>
    "tpu.trace_stop"() : () -> ()
    %186 = arith.truncf %177 : vector<2x8x16xf32> to vector<2x8x16xbf16>
    %187 = vector.extract_strided_slice %97 {offsets = [0, 0, 16], sizes = [2, 16, 8], strides = [1, 1, 1]} : vector<2x16x32xbf16> to vector<2x16x8xbf16>
    "tpu.trace_start"() <{level = 10 : i32, message = "bqk,bkd->bqd"}> : () -> ()
    %cst_59 = arith.constant dense<0.000000e+00> : vector<2x8x8xf32>
    %188 = tpu.matmul %186, %187, %cst_59 {dimension_numbers = #tpu.dot_dimension_numbers<[2], [1], [1], [2], [0, 0, 0, 1, 1, 2], [0], [0]>} : vector<2x8x16xbf16>, vector<2x16x8xbf16>, vector<2x8x8xf32> -> vector<2x8x8xf32>
    "tpu.trace_stop"() : () -> ()
    %189 = arith.addf %185, %188 : vector<2x8x8xf32>
    %190 = tpu.reciprocal %182 {approx = true} : vector<2x8x1xf32> -> vector<2x8x1xf32>
    %191 = vector.broadcast %190 : vector<2x8x1xf32> to vector<2x8x8xf32>
    %192 = arith.mulf %189, %191 : vector<2x8x8xf32>
    %c0_60 = arith.constant 0 : index
    %c0_61 = arith.constant 0 : index
    %c16 = arith.constant 16 : index
    %193 = vector.load %arg15[%c0_60, %c0_61, %c16] : memref<2x8x32xf32, #tpu.memory_space<vmem>>, vector<2x8x8xf32>
    tpu.vector_store %arg15[%c0_60, %c0_61, %c16], %192 {strides = array<i32>} : memref<2x8x32xf32, #tpu.memory_space<vmem>>, vector<2x8x8xf32>,
    %194 = vector.extract_strided_slice %89 {offsets = [0, 0, 24], sizes = [2, 8, 8], strides = [1, 1, 1]} : vector<2x8x32xbf16> to vector<2x8x8xbf16>
    %195 = vector.extract_strided_slice %91 {offsets = [0, 0, 24], sizes = [2, 8, 8], strides = [1, 1, 1]} : vector<2x8x32xbf16> to vector<2x8x8xbf16>
    "tpu.trace_start"() <{level = 10 : i32, message = "bqd,bkd->bqk"}> : () -> ()
    %cst_62 = arith.constant dense<0.000000e+00> : vector<2x8x8xf32>
    %196 = tpu.matmul %194, %195, %cst_62 {dimension_numbers = #tpu.dot_dimension_numbers<[2], [2], [1], [1], [0, 0, 0, 1, 1, 1], [0], [0]>} : vector<2x8x8xbf16>, vector<2x8x8xbf16>, vector<2x8x8xf32> -> vector<2x8x8xf32>
    "tpu.trace_stop"() : () -> ()
    %197 = vector.extract_strided_slice %95 {offsets = [0, 0, 24], sizes = [2, 16, 8], strides = [1, 1, 1]} : vector<2x16x32xbf16> to vector<2x16x8xbf16>
    "tpu.trace_start"() <{level = 10 : i32, message = "bqd,bkd->bqk"}> : () -> ()
    %cst_63 = arith.constant dense<0.000000e+00> : vector<2x8x16xf32>
    %198 = tpu.matmul %194, %197, %cst_63 {dimension_numbers = #tpu.dot_dimension_numbers<[2], [2], [1], [1], [0, 0, 0, 1, 1, 1], [0], [0]>} : vector<2x8x8xbf16>, vector<2x16x8xbf16>, vector<2x8x16xf32> -> vector<2x8x16xf32>
    "tpu.trace_stop"() : () -> ()
    %cst_64 = arith.constant dense<0xFF800000> : vector<2x8xf32>
    %199 = vector.multi_reduction <maximumf>, %196, %cst_64 [2] : vector<2x8x8xf32> to vector<2x8xf32>
    %200 = vector.shape_cast %199 : vector<2x8xf32> to vector<2x8x1xf32>
    %cst_65 = arith.constant dense<0xFF800000> : vector<2x8xf32>
    %201 = vector.multi_reduction <maximumf>, %198, %cst_65 [2] : vector<2x8x16xf32> to vector<2x8xf32>
    %202 = vector.shape_cast %201 : vector<2x8xf32> to vector<2x8x1xf32>
    %203 = arith.maximumf %200, %202 : vector<2x8x1xf32>
    %204 = vector.broadcast %203 : vector<2x8x1xf32> to vector<2x8x8xf32>
    %205 = arith.subf %196, %204 : vector<2x8x8xf32>
    %206 = math.exp %205 : vector<2x8x8xf32>
    %207 = vector.broadcast %203 : vector<2x8x1xf32> to vector<2x8x16xf32>
    %208 = arith.subf %198, %207 : vector<2x8x16xf32>
    %209 = math.exp %208 : vector<2x8x16xf32>
    %cst_66 = arith.constant dense<0.000000e+00> : vector<2x8xf32>
    %210 = vector.multi_reduction <add>, %206, %cst_66 [2] : vector<2x8x8xf32> to vector<2x8xf32>
    %211 = vector.shape_cast %210 : vector<2x8xf32> to vector<2x8x1xf32>
    %cst_67 = arith.constant dense<0.000000e+00> : vector<2x8xf32>
    %212 = vector.multi_reduction <add>, %209, %cst_67 [2] : vector<2x8x16xf32> to vector<2x8xf32>
    %213 = vector.shape_cast %212 : vector<2x8xf32> to vector<2x8x1xf32>
    %214 = arith.addf %211, %213 : vector<2x8x1xf32>
    %215 = arith.truncf %206 : vector<2x8x8xf32> to vector<2x8x8xbf16>
    %216 = vector.extract_strided_slice %93 {offsets = [0, 0, 24], sizes = [2, 8, 8], strides = [1, 1, 1]} : vector<2x8x32xbf16> to vector<2x8x8xbf16>
    "tpu.trace_start"() <{level = 10 : i32, message = "bqk,bkd->bqd"}> : () -> ()
    %cst_68 = arith.constant dense<0.000000e+00> : vector<2x8x8xf32>
    %217 = tpu.matmul %215, %216, %cst_68 {dimension_numbers = #tpu.dot_dimension_numbers<[2], [1], [1], [2], [0, 0, 0, 1, 1, 2], [0], [0]>} : vector<2x8x8xbf16>, vector<2x8x8xbf16>, vector<2x8x8xf32> -> vector<2x8x8xf32>
    "tpu.trace_stop"() : () -> ()
    %218 = arith.truncf %209 : vector<2x8x16xf32> to vector<2x8x16xbf16>
    %219 = vector.extract_strided_slice %97 {offsets = [0, 0, 24], sizes = [2, 16, 8], strides = [1, 1, 1]} : vector<2x16x32xbf16> to vector<2x16x8xbf16>
    "tpu.trace_start"() <{level = 10 : i32, message = "bqk,bkd->bqd"}> : () -> ()
    %cst_69 = arith.constant dense<0.000000e+00> : vector<2x8x8xf32>
    %220 = tpu.matmul %218, %219, %cst_69 {dimension_numbers = #tpu.dot_dimension_numbers<[2], [1], [1], [2], [0, 0, 0, 1, 1, 2], [0], [0]>} : vector<2x8x16xbf16>, vector<2x16x8xbf16>, vector<2x8x8xf32> -> vector<2x8x8xf32>
    "tpu.trace_stop"() : () -> ()
    %221 = arith.addf %217, %220 : vector<2x8x8xf32>
    %222 = tpu.reciprocal %214 {approx = true} : vector<2x8x1xf32> -> vector<2x8x1xf32>
    %223 = vector.broadcast %222 : vector<2x8x1xf32> to vector<2x8x8xf32>
    %224 = arith.mulf %221, %223 : vector<2x8x8xf32>
    %c0_70 = arith.constant 0 : index
    %c0_71 = arith.constant 0 : index
    %c24 = arith.constant 24 : index
    %225 = vector.load %arg15[%c0_70, %c0_71, %c24] : memref<2x8x32xf32, #tpu.memory_space<vmem>>, vector<2x8x8xf32>
    tpu.vector_store %arg15[%c0_70, %c0_71, %c24], %224 {strides = array<i32>} : memref<2x8x32xf32, #tpu.memory_space<vmem>>, vector<2x8x8xf32>,
    %c0_72 = arith.constant 0 : index
    %c0_73 = arith.constant 0 : index
    %c0_74 = arith.constant 0 : index
    %226 = vector.load %arg15[%c0_72, %c0_73, %c0_74] : memref<2x8x32xf32, #tpu.memory_space<vmem>>, vector<2x8x32xf32>
    %227 = arith.truncf %226 : vector<2x8x32xf32> to vector<2x8x32xbf16>
    %228 = vector.shape_cast %227 : vector<2x8x32xbf16> to vector<16x32xbf16>
    %c0_75 = arith.constant 0 : index
    %c0_76 = arith.constant 0 : index
    %229 = vector.load %arg8[%c0_75, %c0_76] : memref<32x32xbf16, #tpu.memory_space<vmem>>, vector<32x32xbf16>
    %cst_77 = arith.constant dense<0.000000e+00> : vector<16x32xf32>
    %230 = tpu.matmul %228, %229, %cst_77 {dimension_numbers = #tpu.dot_dimension_numbers<[1], [0], [0], [1], [0, 0, 1, 1], [], []>} : vector<16x32xbf16>, vector<32x32xbf16>, vector<16x32xf32> -> vector<16x32xf32>
    %c0_78 = arith.constant 0 : index
    %c0_79 = arith.constant 0 : index
    %231 = vector.load %arg9[%c0_78, %c0_79] : memref<1x32xf32, #tpu.memory_space<vmem>>, vector<1x32xf32>
    %232 = vector.broadcast %231 : vector<1x32xf32> to vector<16x32xf32>
    %233 = arith.addf %230, %232 : vector<16x32xf32>
    %234 = vector.shape_cast %233 : vector<16x32xf32> to vector<2x8x32xf32>
    %235 = arith.addf %0, %234 : vector<2x8x32xf32>
    %236 = vector.extract_strided_slice %13 {offsets = [0, 128], sizes = [2, 32], strides = [1, 1]} : vector<2x192xf32> to vector<2x32xf32>
    %237 = vector.extract_strided_slice %13 {offsets = [0, 160], sizes = [2, 32], strides = [1, 1]} : vector<2x192xf32> to vector<2x32xf32>
    %cst_80 = arith.constant dense<0.000000e+00> : vector<2x8xf32>
    %238 = vector.multi_reduction <add>, %235, %cst_80 [2] : vector<2x8x32xf32> to vector<2x8xf32>
    %239 = vector.shape_cast %238 : vector<2x8xf32> to vector<2x8x1xf32>
    %cst_81 = arith.constant 3.200000e+01 : f32
    %240 = vector.broadcast %cst_81 : f32 to vector<2x8x1xf32>
    %241 = arith.divf %239, %240 : vector<2x8x1xf32>
    %242 = vector.broadcast %241 : vector<2x8x1xf32> to vector<2x8x32xf32>
    %243 = arith.subf %235, %242 : vector<2x8x32xf32>
    %244 = arith.mulf %243, %243 : vector<2x8x32xf32>
    %cst_82 = arith.constant dense<0.000000e+00> : vector<2x8xf32>
    %245 = vector.multi_reduction <add>, %244, %cst_82 [2] : vector<2x8x32xf32> to vector<2x8xf32>
    %246 = vector.shape_cast %245 : vector<2x8xf32> to vector<2x8x1xf32>
    %cst_83 = arith.constant 3.200000e+01 : f32
    %247 = vector.broadcast %cst_83 : f32 to vector<2x8x1xf32>
    %248 = arith.divf %246, %247 : vector<2x8x1xf32>
    %249 = vector.broadcast %241 : vector<2x8x1xf32> to vector<2x8x32xf32>
    %250 = arith.subf %235, %249 : vector<2x8x32xf32>
    %cst_84 = arith.constant 9.99999997E-7 : f32
    %251 = vector.broadcast %cst_84 : f32 to vector<2x8x1xf32>
    %252 = arith.addf %248, %251 : vector<2x8x1xf32>
    %253 = math.rsqrt %252 : vector<2x8x1xf32>
    %254 = vector.broadcast %253 : vector<2x8x1xf32> to vector<2x8x32xf32>
    %255 = arith.mulf %250, %254 : vector<2x8x32xf32>
    %256 = vector.shape_cast %237 : vector<2x32xf32> to vector<2x1x32xf32>
    %cst_85 = arith.constant 1.000000e+00 : f32
    %257 = vector.broadcast %cst_85 : f32 to vector<2x1x32xf32>
    %258 = arith.addf %257, %256 : vector<2x1x32xf32>
    %259 = vector.broadcast %258 : vector<2x1x32xf32> to vector<2x8x32xf32>
    %260 = arith.mulf %255, %259 : vector<2x8x32xf32>
    %261 = vector.shape_cast %236 : vector<2x32xf32> to vector<2x1x32xf32>
    %262 = vector.broadcast %261 : vector<2x1x32xf32> to vector<2x8x32xf32>
    %263 = arith.addf %260, %262 : vector<2x8x32xf32>
    %264 = arith.truncf %263 : vector<2x8x32xf32> to vector<2x8x32xbf16>
    %265 = vector.shape_cast %264 : vector<2x8x32xbf16> to vector<16x32xbf16>
    %c0_86 = arith.constant 0 : index
    %c0_87 = arith.constant 0 : index
    %266 = vector.load %arg10[%c0_86, %c0_87] : memref<32x128xbf16, #tpu.memory_space<vmem>>, vector<32x128xbf16>
    %cst_88 = arith.constant dense<0.000000e+00> : vector<16x128xf32>
    %267 = tpu.matmul %265, %266, %cst_88 {dimension_numbers = #tpu.dot_dimension_numbers<[1], [0], [0], [1], [0, 0, 1, 1], [], []>} : vector<16x32xbf16>, vector<32x128xbf16>, vector<16x128xf32> -> vector<16x128xf32>
    %c0_89 = arith.constant 0 : index
    %c0_90 = arith.constant 0 : index
    %268 = vector.load %arg11[%c0_89, %c0_90] : memref<1x128xf32, #tpu.memory_space<vmem>>, vector<1x128xf32>
    %269 = vector.broadcast %268 : vector<1x128xf32> to vector<16x128xf32>
    %270 = arith.addf %267, %269 : vector<16x128xf32>
    %cst_91 = arith.constant 0.000000e+00 : f32
    %271 = vector.broadcast %cst_91 : f32 to vector<16x128xf32>
    %272 = arith.maximumf %270, %271 : vector<16x128xf32>
    %273 = arith.mulf %272, %272 : vector<16x128xf32>
    %274 = arith.truncf %273 : vector<16x128xf32> to vector<16x128xbf16>
    %c0_92 = arith.constant 0 : index
    %c0_93 = arith.constant 0 : index
    %275 = vector.load %arg12[%c0_92, %c0_93] : memref<128x32xbf16, #tpu.memory_space<vmem>>, vector<128x32xbf16>
    %cst_94 = arith.constant dense<0.000000e+00> : vector<16x32xf32>
    %276 = tpu.matmul %274, %275, %cst_94 {dimension_numbers = #tpu.dot_dimension_numbers<[1], [0], [0], [1], [0, 0, 1, 1], [], []>} : vector<16x128xbf16>, vector<128x32xbf16>, vector<16x32xf32> -> vector<16x32xf32>
    %c0_95 = arith.constant 0 : index
    %c0_96 = arith.constant 0 : index
    %277 = vector.load %arg13[%c0_95, %c0_96] : memref<1x32xf32, #tpu.memory_space<vmem>>, vector<1x32xf32>
    %278 = vector.broadcast %277 : vector<1x32xf32> to vector<16x32xf32>
    %279 = arith.addf %276, %278 : vector<16x32xf32>
    %280 = vector.shape_cast %279 : vector<16x32xf32> to vector<2x8x32xf32>
    %281 = arith.addf %235, %280 : vector<2x8x32xf32>
    %c0_97 = arith.constant 0 : index
    %c0_98 = arith.constant 0 : index
    %c0_99 = arith.constant 0 : index
    %282 = vector.load %arg14[%c0_97, %c0_98, %c0_99] : memref<2x8x32xf32, #tpu.memory_space<vmem>>, vector<2x8x32xf32>
    tpu.vector_store %arg14[%c0_97, %c0_98, %c0_99], %281 {strides = array<i32>} : memref<2x8x32xf32, #tpu.memory_space<vmem>>, vector<2x8x32xf32>,
    return
  }
  func.func @transform_0(%arg0: i32) -> (i32, i32, i32) {
    %c0_i32 = arith.constant 0 : i32
    %c0_i32_0 = arith.constant 0 : i32
    %c0_i32_1 = arith.constant 0 : i32
    return %arg0, %c0_i32, %c0_i32_0 : i32, i32, i32
  }
  func.func @transform_1(%arg0: i32) -> (i32, i32, i32) {
    %c0_i32 = arith.constant 0 : i32
    %c0_i32_0 = arith.constant 0 : i32
    %c0_i32_1 = arith.constant 0 : i32
    return %arg0, %c0_i32, %c0_i32_0 : i32, i32, i32
  }
  func.func @transform_2(%arg0: i32) -> (i32, i32) {
    %c0_i32 = arith.constant 0 : i32
    %c0_i32_0 = arith.constant 0 : i32
    return %arg0, %c0_i32 : i32, i32
  }
  func.func @transform_3(%arg0: i32) -> (i32, i32) {
    %c0_i32 = arith.constant 0 : i32
    %c0_i32_0 = arith.constant 0 : i32
    %c0_i32_1 = arith.constant 0 : i32
    return %c0_i32, %c0_i32_0 : i32, i32
  }
  func.func @transform_4(%arg0: i32) -> (i32, i32) {
    %c0_i32 = arith.constant 0 : i32
    %c0_i32_0 = arith.constant 0 : i32
    %c0_i32_1 = arith.constant 0 : i32
    return %c0_i32, %c0_i32_0 : i32, i32
  }
  func.func @transform_5(%arg0: i32) -> (i32, i32) {
    %c0_i32 = arith.constant 0 : i32
    %c0_i32_0 = arith.constant 0 : i32
    %c0_i32_1 = arith.constant 0 : i32
    return %c0_i32, %c0_i32_0 : i32, i32
  }
  func.func @transform_6(%arg0: i32) -> (i32, i32) {
    %c0_i32 = arith.constant 0 : i32
    %c0_i32_0 = arith.constant 0 : i32
    %c0_i32_1 = arith.constant 0 : i32
    return %c0_i32, %c0_i32_0 : i32, i32
  }
  func.func @transform_7(%arg0: i32) -> (i32, i32) {
    %c0_i32 = arith.constant 0 : i32
    %c0_i32_0 = arith.constant 0 : i32
    %c0_i32_1 = arith.constant 0 : i32
    return %c0_i32, %c0_i32_0 : i32, i32
  }
  func.func @transform_8(%arg0: i32) -> (i32, i32) {
    %c0_i32 = arith.constant 0 : i32
    %c0_i32_0 = arith.constant 0 : i32
    %c0_i32_1 = arith.constant 0 : i32
    return %c0_i32, %c0_i32_0 : i32, i32
  }
  func.func @transform_9(%arg0: i32) -> (i32, i32) {
    %c0_i32 = arith.constant 0 : i32
    %c0_i32_0 = arith.constant 0 : i32
    %c0_i32_1 = arith.constant 0 : i32
    return %c0_i32, %c0_i32_0 : i32, i32
  }
  func.func @transform_10(%arg0: i32) -> (i32, i32) {
    %c0_i32 = arith.constant 0 : i32
    %c0_i32_0 = arith.constant 0 : i32
    %c0_i32_1 = arith.constant 0 : i32
    return %c0_i32, %c0_i32_0 : i32, i32
  }
  func.func @transform_11(%arg0: i32) -> (i32, i32) {
    %c0_i32 = arith.constant 0 : i32
    %c0_i32_0 = arith.constant 0 : i32
    %c0_i32_1 = arith.constant 0 : i32
    return %c0_i32, %c0_i32_0 : i32, i32
  }
  func.func @transform_12(%arg0: i32) -> (i32, i32) {
    %c0_i32 = arith.constant 0 : i32
    %c0_i32_0 = arith.constant 0 : i32
    %c0_i32_1 = arith.constant 0 : i32
    return %c0_i32, %c0_i32_0 : i32, i32
  }
  func.func @transform_13(%arg0: i32) -> (i32, i32, i32) {
    %c0_i32 = arith.constant 0 : i32
    %c0_i32_0 = arith.constant 0 : i32
    %c0_i32_1 = arith.constant 0 : i32
    return %arg0, %c0_i32, %c0_i32_0 : i32, i32, i32
  }
}

</mosaic_0001>

<bundles_post_ra>
// kernel: tpu_custom_call.1
= control target key start
LH: loop header
LB: loop body
LE: loop exit
PB: predicated region body
PF: predicated region fallthrough
CT: control target
= control target key end

     0   :  { %18 = vsyncpa [#allocation4], 0  ;;  %s4098_s0 = inlined_call_operand.hbm [shape: f32[2,16,32], index: 0, kind: input, shape index: {}]   ;;  %s4099_s1 = inlined_call_operand.vmem [shape: f32[2,8,32], index: 1, kind: input, shape index: {}]   ;;  %s4100_s2 = inlined_call_operand.vmem [shape: f32[2,32], index: 2, kind: input, shape index: {}]   ;;  %s4101_s3 = inlined_call_operand.vmem [shape: f32[32,192], index: 3, kind: input, shape index: {}]   ;;  %s4102_s4 = inlined_call_operand.hbm [shape: f32[1,192], index: 4, kind: input, shape index: {}]   ;;  %s4103_s5 = inlined_call_operand.hbm [shape: bf16[32,96], index: 5, kind: input, shape index: {}]   ;;  %s4104_s6 = inlined_call_operand.hbm [shape: f32[1,96], index: 6, kind: input, shape index: {}]   ;;  %s4105_s7 = inlined_call_operand.hbm [shape: bf16[32,32], index: 7, kind: input, shape index: {}]   ;;  %s4106_s8 = inlined_call_operand.hbm [shape: f32[1,32], index: 8, kind: input, shape index: {}]   ;;  %s4107_s9 = inlined_call_operand.vmem [shape: bf16[32,128], index: 9, kind: input, shape index: {}]   ;;  %s4108_s10 = inlined_call_operand.vmem [shape: f32[1,128], index: 10, kind: input, shape index: {}]   ;;  %s4109_s11 = inlined_call_operand.vmem [shape: bf16[128,32], index: 11, kind: input, shape index: {}]   ;;  %s4110_s12 = inlined_call_operand.vmem [shape: f32[1,32], index: 12, kind: input, shape index: {}]   ;;  %s4111_s13 = inlined_call_operand.hbm [shape: f32[2,8,32], index: 13, kind: output, shape index: {}]  }
   0x1   :  { %19 = vsyncpa [#allocation7], 0 }
   0x2   :  { %20 = vsyncpa [#allocation10], 0 }
   0x3   :  { %21 = vsyncpa [#allocation13], 0 }
   0x4   :  { %22 = vsyncpa [#allocation5], 0  ;;  %s3359_s25 = smov [#allocation6]   ;;  %s3360_s27 = smov [#allocation9]  }
   0x5   :  { %s47_s26 = sshll.u32 %s3359_s25, 4  ;;  %s69_s28 = sshll.u32 %s3360_s27, 4  ;;  %s48_s26 = int_to_ptr.vmem [resolvable:$true] %s47_s26  ;;  %s70_s28 = int_to_ptr.vmem [resolvable:$true] %s69_s28 }
   0x6   :  { %s3195_s14 = scalar_lea.hbm %s4102_s4, 32 }
   0x7   :  { %p3196_p0 = scmp.ne.s32.totalorder %s4102_s4, %s3195_s14  ;;  %p3199_p1 = scmp.lt.u32.totalorder %s3195_s14, %s4102_s4 }
   0x9   :  { %p3201_p2 = pnand %p3199_p1, %p3196_p0 }
   0xb   :  { %3204 = shalt.err (!%p3201_p2)
}
   0xc   :  { %s3205_s19 = scalar_lea.vmem %s48_s26, 32  ;;  %p3210_p4 = scmp.lt.s32.totalorder %s48_s26, %s48_s26 }
   0xd   :  { %p3206_p3 = scmp.ne.s32.totalorder %s48_s26, %s3205_s19  ;;  %p3211_p5 = scmp.lt.s32.totalorder %s3205_s19, %s3205_s19 }
   0xf   :  { %p3212_p6 = por %p3211_p5, %p3210_p4 }
  0x11   :  { %p3213_p7 = pnand %p3212_p6, %p3206_p3 }
  0x13   :  { %3216 = shalt.err (!%p3213_p7)
}
  0x14   :  { %50 = dma.hbm_to_vmem [thread:$0]  %s4102_s4, 32, %s48_s26, [#allocation7]  }
  0x15   :  { %s3217_s24 = scalar_lea.hbm %s4104_s6, 16 }
  0x16   :  { %p3218_p8 = scmp.ne.s32.totalorder %s4104_s6, %s3217_s24  ;;  %p3221_p9 = scmp.lt.u32.totalorder %s3217_s24, %s4104_s6 }
  0x18   :  { %p3223_p10 = pnand %p3221_p9, %p3218_p8 }
  0x1a   :  { %3226 = shalt.err (!%p3223_p10)
}
  0x1b   :  { %s3227_s14 = scalar_lea.vmem %s70_s28, 16  ;;  %s3231_s15 = scalar_lea.vmem %s70_s28, 32 }
  0x1c   :  { %p3228_p11 = scmp.ne.s32.totalorder %s70_s28, %s3227_s14  ;;  %p3232_p12 = scmp.lt.s32.totalorder %s70_s28, %s70_s28 }
  0x1d   :  { %p3233_p13 = scmp.lt.s32.totalorder %s3231_s15, %s3227_s14 }
  0x1f   :  { %p3234_p0 = por %p3233_p13, %p3232_p12 }
  0x21   :  { %p3235_p1 = pnand %p3234_p0, %p3228_p11 }
  0x23   :  { %3238 = shalt.err (!%p3235_p1)
}
  0x24   :  { %72 = dma.hbm_to_vmem [thread:$0]  %s4104_s6, 16, %s70_s28, [#allocation10]  }
  0x25   :  { %s3361_s16 = smov [#allocation3]   ;;  %s3239_s20 = scalar_lea.hbm %s4098_s0, 512 }
  0x26   :  { %s28_s17 = sshll.u32 %s3361_s16, 4  ;;  %p3240_p2 = scmp.ne.s32.totalorder %s4098_s0, %s3239_s20  ;;  %s29_s17 = int_to_ptr.vmem [resolvable:$true] %s28_s17 }
  0x27   :  { %p3243_p3 = scmp.lt.u32.totalorder %s3239_s20, %s4098_s0 }
  0x29   :  { %p3245_p4 = pnand %p3243_p3, %p3240_p2 }
  0x2b   :  { %3248 = shalt.err (!%p3245_p4)
}
  0x2c   :  { %s3249_s25 = scalar_lea.vmem %s29_s17, 512  ;;  %p3254_p6 = scmp.lt.s32.totalorder %s29_s17, %s29_s17 }
  0x2d   :  { %p3250_p5 = scmp.ne.s32.totalorder %s29_s17, %s3249_s25  ;;  %p3255_p7 = scmp.lt.s32.totalorder %s3249_s25, %s3249_s25 }
  0x2f   :  { %p3256_p8 = por %p3255_p7, %p3254_p6 }
  0x31   :  { %p3257_p9 = pnand %p3256_p8, %p3250_p5 }
  0x33   :  { %3260 = shalt.err (!%p3257_p9)
}
  0x34   :  { %s3362_s6 = smov 128   ;;  %s3363_s28 = smov 8  }
  0x35   :  { %34 = dma.hbm_to_vmem [thread:$0]  %s4098_s0, 512, %s29_s17, [#allocation4], %s3362_s6, %s3362_s6, %s3363_s28  }
  0x36   :  { %s3364_s30 = smov [#allocation8]   ;;  %s3261_s26 = scalar_lea.hbm %s4103_s5, 256 }
  0x37   :  { %s56_s14 = sshll.u32 %s3364_s30, 4  ;;  %p3262_p10 = scmp.ne.s32.totalorder %s4103_s5, %s3261_s26  ;;  %s57_s14 = int_to_ptr.vmem [resolvable:$true] %s56_s14 }
  0x38   :  { %p3265_p11 = scmp.lt.u32.totalorder %s3261_s26, %s4103_s5 }
  0x3a   :  { %p3267_p12 = pnand %p3265_p11, %p3262_p10 }
  0x3c   :  { %3270 = shalt.err (!%p3267_p12)
}
  0x3d   :  { %s3271_s21 = scalar_lea.vmem %s57_s14, 256  ;;  %p3276_p0 = scmp.lt.s32.totalorder %s57_s14, %s57_s14 }
  0x3e   :  { %p3272_p13 = scmp.ne.s32.totalorder %s57_s14, %s3271_s21  ;;  %p3277_p1 = scmp.lt.s32.totalorder %s3271_s21, %s3271_s21 }
  0x40   :  { %p3278_p2 = por %p3277_p1, %p3276_p0 }
  0x42   :  { %p3279_p3 = pnand %p3278_p2, %p3272_p13 }
  0x44   :  { %3282 = shalt.err (!%p3279_p3)
}
  0x45   :  { %s3365_s0 = smov 64   ;;  %s3366_s17 = smov 4  }
  0x46   :  { %62 = dma.hbm_to_vmem [thread:$0]  %s4103_s5, 256, %s57_s14, [#allocation7], %s3365_s0, %s3365_s0, %s3366_s17  }
  0x47   :  { %s3367_s24 = smov [#allocation11]   ;;  %s3368_s27 = smov [#allocation12]  }
  0x48   :  { %s78_s25 = sshll.u32 %s3367_s24, 4  ;;  %s91_s29 = sshll.u32 %s3368_s27, 4  ;;  %s79_s25 = int_to_ptr.vmem [resolvable:$true] %s78_s25  ;;  %s92_s29 = int_to_ptr.vmem [resolvable:$true] %s91_s29 }
  0x49   :  { %s3283_s4 = scalar_lea.hbm %s4105_s7, 256 }
  0x4a   :  { %p3284_p4 = scmp.ne.s32.totalorder %s4105_s7, %s3283_s4  ;;  %p3287_p5 = scmp.lt.u32.totalorder %s3283_s4, %s4105_s7 }
  0x4c   :  { %p3289_p6 = pnand %p3287_p5, %p3284_p4 }
  0x4e   :  { %3292 = shalt.err (!%p3289_p6)
}
  0x4f   :  { %s3293_s5 = scalar_lea.vmem %s79_s25, 256  ;;  %p3298_p8 = scmp.lt.s32.totalorder %s79_s25, %s79_s25 }
  0x50   :  { %p3294_p7 = scmp.ne.s32.totalorder %s79_s25, %s3293_s5  ;;  %p3299_p9 = scmp.lt.s32.totalorder %s3293_s5, %s3293_s5 }
  0x52   :  { %p3300_p10 = por %p3299_p9, %p3298_p8 }
  0x54   :  { %p3301_p11 = pnand %p3300_p10, %p3294_p7 }
  0x56   :  { %3304 = shalt.err (!%p3301_p11)
}
  0x57   :  { %84 = dma.hbm_to_vmem [thread:$0]  %s4105_s7, 256, %s79_s25, [#allocation10], %s3365_s0, %s3365_s0, %s3366_s17  }
  0x58   :  { %s3305_s23 = scalar_lea.hbm %s4106_s8, 16 }
  0x59   :  { %p3306_p12 = scmp.ne.s32.totalorder %s4106_s8, %s3305_s23  ;;  %p3309_p13 = scmp.lt.u32.totalorder %s3305_s23, %s4106_s8 }
  0x5b   :  { %p3311_p0 = pnand %p3309_p13, %p3306_p12 }
  0x5d   :  { %3314 = shalt.err (!%p3311_p0)
}
  0x5e   :  { %s3315_s4 = scalar_lea.vmem %s92_s29, 16  ;;  %s3319_s26 = scalar_lea.vmem %s92_s29, 32 }
  0x5f   :  { %p3316_p1 = scmp.ne.s32.totalorder %s92_s29, %s3315_s4  ;;  %p3320_p2 = scmp.lt.s32.totalorder %s92_s29, %s92_s29 }
  0x60   :  { %p3321_p3 = scmp.lt.s32.totalorder %s3319_s26, %s3315_s4 }
  0x62   :  { %p3322_p4 = por %p3321_p3, %p3320_p2 }
  0x64   :  { %p3323_p5 = pnand %p3322_p4, %p3316_p1 }
  0x66   :  { %3326 = shalt.err (!%p3323_p5)
}
  0x67   :  { %94 = dma.hbm_to_vmem [thread:$0]  %s4106_s8, 16, %s92_s29, [#allocation13]  }
  0x68   :  { %3349 = dma.done.wait [#allocation4], 512  }
  0x69   :  { %3350 = vsyncadd [#allocation4], 4294966784 }
  0x6a   :  { %3351 = dma.done.wait [#allocation7], 288  }
  0x6b   :  { %3352 = vsyncadd [#allocation7], 4294967008 }
  0x6c   :  { %3353 = dma.done.wait [#allocation10], 272  }
  0x6d   :  { %3354 = vsyncadd [#allocation10], 4294967024 }
  0x6e   :  { %3355 = dma.done.wait [#allocation13], 16  }
  0x6f   :  { %3356 = vsyncadd [#allocation13], 4294967280  ;;  %v3369_v0 = vmov 0.0   ;;  %vm156_vm0 = vcmask 261120   ;;  %v122_v1 = vld [vmem:[%s4099_s1] sm:$0xff]  ;;  %v123_v2 = vld [vmem:[%s4099_s1 + $0x8] sm:$0xff]  ;;  %v146_v43 = vlaneseq }
  0x70   :  { %224 = vmatprep.mubr.f32.mxu0 %v3369_v0  ;;  %2816 = vmatprep.subr.bf16.mxu1 %v3369_v0  ;;  %v137_v3 = vld [vmem:[%s4101_s3 + $0x8] sm:$0xff]  ;;  %v231_v4 = vsel %vm156_vm0, %v122_v1, 0.0  ;;  %v139_v5 = vld [vmem:[%s4101_s3 + $0x18] sm:$0xff]  ;;  %v136_v6 = vld [vmem:[%s4101_s3] sm:$0xff]  ;;  %v234_v13 = vsel %vm156_vm0, %v123_v2, 0.0  ;;  %vm3371_vm1 = vmmov 0  }
  0x71   :  { %v138_v7 = vld [vmem:[%s4101_s3 + $0x10] sm:$0xff]  ;;  %232 = vadd.xlane.f32.xlu0 %v231_v4  ;;  %v3044_v8 = vpack.c.bf16 %v139_v5, %v137_v3  ;;  %v141_v10 = vld [vmem:[%s4101_s3 + $0x28] sm:$0xff]  ;;  %v143_v11 = vld [vmem:[%s4101_s3 + $0x38] sm:$0xff]  ;;  %v147_v44 = vshrl.u32 %v146_v43, 7  ;;  %v3370_v45 = vmov 1966171168   ;;  %2818 = vmatprep.mubr.msk.bf16.mxu1 %vm3371_vm1, %v3369_v0 }
  0x72   :  { %v3046_v9 = vpack.c.bf16 %v138_v7, %v136_v6  ;;  %v140_v12 = vld [vmem:[%s4101_s3 + $0x20] sm:$0xff]  ;;  %v3048_v14 = vpack.c.bf16 %v143_v11, %v141_v10  ;;  %v142_v15 = vld [vmem:[%s4101_s3 + $0x30] sm:$0xff]  ;;  %v3576_v20 = vld [vmem:[#allocation3 + $0x8] sm:$0xff]  ;;  %v260_v46 = vunpack.c.l.s4 %v3370_v45  ;;  %s3373_s3 = smov 32   ;;  %vm538_vm2 = vcmask 64512   ;;  %s3374_s18 = smov 88  }
  0x73   :  { %v128_v16 = vld [vmem:[%s4100_s2] sm:$0x3]  ;;  %v3572_v17 = vld [vmem:[#allocation3] sm:$0xff]  ;;  %3045 = vmatprep.subr.bf16.mxu0 %v3044_v8  ;;  %v3050_v22 = vpack.c.bf16 %v142_v15, %v140_v12  ;;  %v318_v23 = vsel %vm156_vm0, %v3576_v20, 0.0  ;;  %v3585_v27 = vld [vmem:[#allocation3 + $0x18] sm:$0xff]  ;;  %v3604_v47 = vsub.s32 0, %v147_v44 }
  0x74   :  { %v2651_v18 = vmul.f32 -1.442695, %v128_v16  ;;  %v315_v19 = vsel %vm156_vm0, %v3572_v17, 0.0  ;;  %v3578_v21 = vld [vmem:[#allocation3 + $0x10] sm:$0xff]  ;;  %3047 = vmatpush1.bf16.msra.mxu0 %v3046_v9  ;;  %v324_v28 = vsel %vm156_vm0, %v3585_v27, 0.0  ;;  %v3111_v41 = vld [vmem:[#allocation8] sm:$0xff]   ;;  %v261_v50 = vunpack.c.0.s8 %v260_v46 }
  0x75   :  { %316 = vadd.xlane.f32.xlu1 %v315_v19  ;;  %v321_v24 = vsel %vm156_vm0, %v3578_v21, 0.0  ;;  %235 = vadd.xlane.f32.xlu0 %v234_v13  ;;  %v3601_v42 = vld [vmem:[#allocation8 + $0x8] sm:$0xff]   ;;  %v144_v48 = vld [vmem:[#allocation6] sm:$0x3]  ;;  %v152_v49 = vsub.s32 1, %v147_v44  ;;  %s3372_s2 = smov 96  }
  0x76   :  { %3049 = vmatprep.subr.bf16.mxu0 %v3048_v14  ;;  %3125 = vpow2.f32 %v2651_v18  ;;  %v149_v51 = vrot.slane %v144_v48, %v3604_v47  ;;  %v264_v53 = vsub.s32 %v261_v50, %v147_v44  ;;  %vm726_vm3 = vcmask 130048   ;;  %s3375_s8 = smov 120   ;;  %s3377_s29 = smov 80  }
  0x77   :  { %v153_v52 = vrot.slane %v144_v48, %v152_v49  ;;  %vm864_vm4 = vcmask 1043456   ;;  %s3378_s19 = smov 112   ;;  %s3379_s5 = smov 48   ;;  %vm1398_vm5 = vcmask 130112   ;;  %vm1835_vm6 = vcmask 195712  }
  0x78   :  { %3051 = vmatpush1.bf16.msra.mxu0 %v3050_v22  ;;  %s3380_s14 = smov 72   ;;  %s3381_s20 = smov 104   ;;  %vm2272_vm7 = vcmask 261312  }
  0x79   :  { %319 = vadd.xlane.f32.xlu1 %v318_v23  ;;  %322 = vadd.xlane.f32.xlu0 %v321_v24  ;;  %s3382_s21 = smov 40   ;;  %s3383_s22 = smov 16  }
  0x7a   :  { %2800 = vmatprep.subr.bf16.mxu0 %v3369_v0  ;;  %s3384_s23 = smov 24  }
  0x7d   :  { %325 = vadd.xlane.f32.xlu1 %v324_v28 }
  0x80   :  { %v3126_v25 = vpop.eup %3125 }
  0x81   :  { %v132_v26 = vadd.f32 1.0, %v3126_v25 }
  0x83   :  { %3127 = vrcp.f32 %v132_v26 }
  0x8d   :  { %v3128_v29 = vpop.eup %3127 }
  0x8e   :  { %v135_v30 = vmul.f32 %v3128_v29, %v128_v16 }
  0x90   :  { %2652 = vmatmul.mubr.msk.f32.vlgmr.msra.gmra.mrb[0].mxu0 %vm156_vm0, %v135_v30 }
  0x91   :  { %2801 = vmatpush3.bf16.msra.mxu0 %v3111_v41  ;;  %2804 = vmatprep.mubr.msk.bf16.mxu0 %vm3371_vm1, %v3369_v0 }
  0x92   :  { %2802 = vmatprep.subr.bf16.mxu0 %v3369_v0 }
  0x95   :  { %2803 = vmatpush3.bf16.msra.mxu0 %v3601_v42 }
  0xfe   :  { %v233_v31 = vpop.xlane.xlu0 %232 }
  0xff   :  { %v238_v32 = vmul.f32 0.03125, %v233_v31 }
 0x101   :  { %v3590_v33 = vsub.f32 %v122_v1, %v238_v32 }
 0x102   :  { %v236_v34 = vpop.xlane.xlu0 %235  ;;  %v317_v7 = vpop.xlane.xlu1 %316 }
 0x103   :  { %v239_v35 = vmul.f32 0.03125, %v236_v34  ;;  %v242_v36 = vmul.f32 %v3590_v33, %v3590_v33  ;;  %v327_v13 = vmul.f32 0.03125, %v317_v7 }
 0x105   :  { %v3594_v37 = vsub.f32 %v123_v2, %v239_v35  ;;  %v244_v38 = vsel %vm156_vm0, %v242_v36, 0.0  ;;  %v3628_v18 = vsub.f32 %v3572_v17, %v327_v13 }
 0x106   :  { %245 = vadd.xlane.f32.xlu0 %v244_v38  ;;  %v320_v8 = vpop.xlane.xlu1 %319  ;;  %v323_v10 = vpop.xlane.xlu0 %322 }
 0x107   :  { %v243_v39 = vmul.f32 %v3594_v37, %v3594_v37  ;;  %v328_v9 = vmul.f32 0.03125, %v320_v8  ;;  %v329_v12 = vmul.f32 0.03125, %v323_v10 }
 0x109   :  { %v247_v40 = vsel %vm156_vm0, %v243_v39, 0.0  ;;  %v3620_v11 = vsub.f32 %v3576_v20, %v328_v9  ;;  %v3623_v14 = vsub.f32 %v3578_v21, %v329_v12  ;;  %v335_v21 = vmul.f32 %v3628_v18, %v3628_v18 }
 0x10a   :  { %248 = vadd.xlane.f32.xlu1 %v247_v40  ;;  %v326_v16 = vpop.xlane.xlu1 %325 }
 0x10b   :  { %v336_v15 = vmul.f32 %v3620_v11, %v3620_v11  ;;  %v330_v19 = vmul.f32 0.03125, %v326_v16  ;;  %v337_v23 = vmul.f32 %v3623_v14, %v3623_v14  ;;  %v339_v25 = vsel %vm156_vm0, %v335_v21, 0.0 }
 0x10d   :  { %v342_v22 = vsel %vm156_vm0, %v336_v15, 0.0  ;;  %v3634_v20 = vsub.f32 %v3585_v27, %v330_v19  ;;  %v345_v24 = vsel %vm156_vm0, %v337_v23, 0.0 }
 0x10f   :  { %v338_v17 = vmul.f32 %v3634_v20, %v3634_v20 }
 0x111   :  { %v348_v26 = vsel %vm156_vm0, %v338_v17, 0.0 }
 0x163   :  { %v226_v54 = vpop.f32.mrb[0].mxu0 }
 0x164   :  { %v227_v55 = vadd.f32 %v226_v54, %v149_v51  ;;  %v228_v56 = vpop.f32.mrb[1].mxu0 }
 0x165   :  { %v229_v57 = vadd.f32 %v228_v56, %v153_v52 }
 0x166   :  { %v265_v58 = vrot.slane %v227_v55, %v264_v53 }
 0x167   :  { %v2386_v59 = vrot.slane %v229_v57, %v264_v53 }
 0x168   :  { %v266_v60 = vcombine.high %v265_v58, %v265_v58  ;;  %v273_v61 = vrot.slane %v265_v58, %v264_v53 }
 0x169   :  { %v2387_v62 = vcombine.high %v2386_v59, %v2386_v59  ;;  %v3611_v63 = vrot.slane %v2386_v59, %v264_v53 }
 0x16a   :  { %v280_v1 = vrot.slane %v266_v60, %v264_v53  ;;  %v283_v2 = vadd.f32 1.0, %v273_v61  ;;  %v306_v28 = vrot.slane %v273_v61, %v3604_v47 }
 0x16b   :  { %v3613_v3 = vrot.slane %v2387_v62, %v264_v53 }
 0x16c   :  { %v290_v4 = vrot.slane %v283_v2, %v3604_v47  ;;  %v284_v5 = vadd.f32 1.0, %v280_v1  ;;  %v310_v27 = vrot.slane %v280_v1, %v3604_v47 }
 0x16e   :  { %295 = vrot.lane.b32.xlu0 %v290_v4, %s3372_s2  ;;  %v294_v6 = vrot.slane %v284_v5, %v3604_v47 }
 0x170   :  { %297 = vrot.lane.b32.xlu1 %v294_v6, %s3372_s2 }
 0x18d   :  { %343 = vadd.xlane.f32.xlu0 %v342_v22 }
 0x191   :  { %346 = vadd.xlane.f32.xlu0 %v345_v24 }
 0x193   :  { %v246_v29 = vpop.xlane.xlu0 %245 }
 0x194   :  { %340 = vadd.xlane.f32.xlu1 %v339_v25  ;;  %v250_v31 = vmul.f32 0.03125, %v246_v29 }
 0x196   :  { %v252_v34 = vadd.f32 1e-06, %v250_v31 }
 0x197   :  { %v249_v30 = vpop.xlane.xlu1 %248 }
 0x198   :  { %349 = vadd.xlane.f32.xlu1 %v348_v26  ;;  %v251_v32 = vmul.f32 0.03125, %v249_v30  ;;  %3129 = vrsqrt.f32 %v252_v34 }
 0x19a   :  { %v253_v35 = vadd.f32 1e-06, %v251_v32 }
 0x19c   :  { %3131 = vrsqrt.f32 %v253_v35 }
 0x1a2   :  { %v3130_v36 = vpop.eup %3129 }
 0x1a3   :  { %v256_v39 = vmul.f32 %v3130_v36, %v3590_v33 }
 0x1a6   :  { %v3132_v38 = vpop.eup %3131 }
 0x1a7   :  { %463 = vrot.lane.b32.xlu0 %v3111_v41, %s3372_s2  ;;  %v257_v43 = vmul.f32 %v3132_v38, %v3594_v37 }
 0x1a9   :  { %367 = vrot.lane.b32.xlu1 %v290_v4, %s3373_s3 }
 0x1ab   :  { %379 = vrot.lane.b32.xlu0 %v310_v27, %s3365_s0 }
 0x1ad   :  { %377 = vrot.lane.b32.xlu1 %v306_v28, %s3365_s0 }
 0x1b1   :  { %369 = vrot.lane.b32.xlu1 %v294_v6, %s3373_s3 }
 0x1b5   :  { %465 = vrot.lane.b32.xlu1 %v3601_v42, %s3372_s2 }
 0x1e0   :  { %v296_v40 = vpop.permute.xlu0 %295 }
 0x1e1   :  { %v301_v41 = vmul.f32 %v296_v40, %v256_v39 }
 0x1e2   :  { %v298_v44 = vpop.permute.xlu1 %297 }
 0x1e3   :  { %v302_v45 = vmul.f32 %v298_v44, %v257_v43  ;;  %v313_v46 = vadd.f32 %v306_v28, %v301_v41 }
 0x1e5   :  { %v314_v42 = vadd.f32 %v310_v27, %v302_v45 }
 0x1e7   :  { %v2711_v48 = vpack.c.bf16 %v314_v42, %v313_v46 }
 0x1e9   :  { %2805 = vmatmul.mubr.msk.bf16.vlgmr.msra.gmra.mrb[4].mxu0 %vm156_vm0, %v2711_v48 }
 0x21a   :  { %v344_v49 = vpop.xlane.xlu0 %343 }
 0x21b   :  { %v352_v50 = vmul.f32 0.03125, %v344_v49 }
 0x21d   :  { %v356_v51 = vadd.f32 1e-06, %v352_v50 }
 0x21e   :  { %v347_v52 = vpop.xlane.xlu0 %346 }
 0x21f   :  { %v353_v53 = vmul.f32 0.03125, %v347_v52  ;;  %3133 = vrsqrt.f32 %v356_v51 }
 0x221   :  { %v357_v54 = vadd.f32 1e-06, %v353_v53  ;;  %v341_v55 = vpop.xlane.xlu1 %340 }
 0x222   :  { %v351_v33 = vmul.f32 0.03125, %v341_v55  ;;  %v464_v56 = vpop.permute.xlu0 %463 }
 0x223   :  { %2808 = vmatprep.subr.bf16.mxu0 %v464_v56  ;;  %3135 = vrsqrt.f32 %v357_v54 }
 0x224   :  { %v355_v57 = vadd.f32 1e-06, %v351_v33  ;;  %2809 = vmatpush3.bf16.msra.mxu0 %v464_v56 }
 0x225   :  { %v350_v37 = vpop.xlane.xlu1 %349 }
 0x226   :  { %3137 = vrsqrt.f32 %v355_v57  ;;  %v354_v58 = vmul.f32 0.03125, %v350_v37  ;;  %v380_v23 = vpop.permute.xlu0 %379 }
 0x228   :  { %v358_v59 = vadd.f32 1e-06, %v354_v58 }
 0x229   :  { %v368_v60 = vpop.permute.xlu1 %367  ;;  %v3134_v61 = vpop.eup %3133 }
 0x22a   :  { %3139 = vrsqrt.f32 %v358_v59  ;;  %v364_v62 = vmul.f32 %v3134_v61, %v3620_v11 }
 0x22c   :  { %v374_v6 = vmul.f32 %v368_v60, %v364_v62 }
 0x22d   :  { %v378_v1 = vpop.permute.xlu1 %377  ;;  %v3136_v2 = vpop.eup %3135 }
 0x22e   :  { %v365_v9 = vmul.f32 %v3136_v2, %v3623_v14  ;;  %v384_v13 = vadd.f32 %v378_v1, %v374_v6  ;;  %v2653_v14 = vld [vmem:[#allocation9] ss:$0 sm:$0xff] }
 0x230   :  { %v3138_v4 = vpop.eup %3137 }
 0x231   :  { %v363_v5 = vmul.f32 %v3138_v4, %v3628_v18  ;;  %v370_v7 = vpop.permute.xlu1 %369 }
 0x232   :  { %v375_v16 = vmul.f32 %v370_v7, %v365_v9 }
 0x233   :  { %v373_v8 = vmul.f32 %v368_v60, %v363_v5 }
 0x234   :  { %v3140_v10 = vpop.eup %3139  ;;  %v385_v18 = vadd.f32 %v380_v23, %v375_v16 }
 0x235   :  { %v383_v12 = vadd.f32 %v378_v1, %v373_v8  ;;  %v366_v15 = vmul.f32 %v3140_v10, %v3634_v20  ;;  %v466_v19 = vpop.permute.xlu1 %465 }
 0x236   :  { %2810 = vmatprep.subr.bf16.mxu0 %v466_v19 }
 0x237   :  { %v461_v22 = vpack.c.bf16 %v384_v13, %v383_v12  ;;  %v376_v11 = vmul.f32 %v370_v7, %v366_v15  ;;  %2811 = vmatpush3.bf16.msra.mxu0 %v466_v19 }
 0x238   :  { %2822 = vmatprep.subr.bf16.mxu0 %v3369_v0 }
 0x239   :  { %v386_v21 = vadd.f32 %v380_v23, %v376_v11  ;;  %2812 = vmatprep.mubr.msk.bf16.mxu0 %vm156_vm0, %v461_v22 }
 0x23b   :  { %v462_v24 = vpack.c.bf16 %v386_v21, %v385_v18 }
 0x23d   :  { %2813 = vmatmul.mubr.msk.bf16.vlgmr.msra.gmra.mrb[8].mxu0 %vm156_vm0, %v462_v24 }
 0x23e   :  { %2824 = vmatprep.mubr.msk.bf16.mxu0 %vm3371_vm1, %v3369_v0 }
 0x2bc   :  { %v454_v20 = vpop.f32.mrb[4].mxu0 }
 0x2bd   :  { %v455_v25 = vadd.f32 %v2653_v14, %v454_v20  ;;  %v2806_v17 = vpop.f32.mrb[5].mxu0 }
 0x2be   :  { %v457_v26 = vpop.f32.mrb[6].mxu0 }
 0x2bf   :  { %v3662_v27 = vpack.c.bf16 %v455_v25, %v455_v25  ;;  %v458_v28 = vadd.f32 %v2653_v14, %v457_v26  ;;  %v2807_v29 = vpop.f32.mrb[7].mxu0  ;;  %v527_v40 = vmul.f32 0.35355338, %v455_v25 }
 0x2c1   :  { %v3664_v30 = vpack.c.bf16 %v458_v28, %v458_v28  ;;  %536 = vrot.lane.b32.xlu0 %v3662_v27, %s3372_s2  ;;  %v528_v43 = vmul.f32 0.35355338, %v458_v28  ;;  %v3675_v49 = vpack.c.bf16 %v527_v40, %v527_v40 }
 0x2c3   :  { %586 = vrot.lane.b32.xlu1 %v3664_v30, %s3372_s2  ;;  %v3681_v52 = vpack.c.bf16 %v528_v43, %v528_v43 }
 0x2c5   :  { %469 = vrot.lane.b32.xlu0 %v2653_v14, %s3372_s2 }
 0x310   :  { %v2814_v31 = vpop.f32.mrb[8].mxu0 }
 0x311   :  { %v512_v32 = vpop.f32.mrb[9].mxu0 }
 0x312   :  { %v2815_v34 = vpop.f32.mrb[10].mxu0 }
 0x313   :  { %v515_v35 = vpop.f32.mrb[11].mxu0 }
 0x333   :  { %v537_v36 = vpop.permute.xlu0 %536 }
 0x334   :  { %v543_v38 = vsel %vm538_vm2, %v537_v36, 0 }
 0x335   :  { %v587_v39 = vpop.permute.xlu1 %586  ;;  %2817 = vmatpush3.bf16.xpose.msra.mxu1 %v543_v38 }
 0x336   :  { %v592_v41 = vsel %vm538_vm2, %v587_v39, 0  ;;  %2828 = vmatprep.subr.bf16.mxu1 %v3369_v0 }
 0x337   :  { %2823 = vmatpush3.bf16.xpose.msra.mxu0 %v592_v41  ;;  %v470_v44 = vpop.permute.xlu0 %469 }
 0x338   :  { %v513_v45 = vadd.f32 %v512_v32, %v470_v44  ;;  %v521_v46 = vadd.f32 %v2814_v31, %v470_v44  ;;  %v516_v42 = vadd.f32 %v515_v35, %v470_v44  ;;  %v524_v48 = vadd.f32 %v2815_v34, %v470_v44  ;;  %2834 = vmatprep.subr.bf16.mxu0 %v3369_v0 }
 0x33a   :  { %v3677_v50 = vpack.c.bf16 %v516_v42, %v513_v45  ;;  %v3679_v51 = vpack.c.bf16 %v524_v48, %v521_v46 }
 0x33c   :  { %2819 = vmatmul.mubr.msk.bf16.vlgmr.msra.gmra.mrb[0].mxu1 %vm538_vm2, %v3675_v49  ;;  %766 = vrot.lane.b32.xlu1 %v3677_v50, %s3372_s2  ;;  %v635_v53 = vsel %vm538_vm2, %v3677_v50, 0  ;;  %v678_v54 = vsel %vm538_vm2, %v3679_v51, 0 }
 0x33d   :  { %2829 = vmatpush3.bf16.xpose.msra.mxu1 %v635_v53  ;;  %2830 = vmatprep.mubr.msk.bf16.mxu1 %vm3371_vm1, %v3369_v0 }
 0x33e   :  { %2825 = vmatmul.mubr.msk.bf16.vlgmr.msra.gmra.mrb[12].mxu0 %vm538_vm2, %v3681_v52  ;;  %2840 = vmatprep.subr.bf16.mxu1 %v3369_v0 }
 0x33f   :  { %2835 = vmatpush3.bf16.xpose.msra.mxu0 %v678_v54  ;;  %2836 = vmatprep.mubr.msk.bf16.mxu0 %vm3371_vm1, %v3369_v0 }
 0x340   :  { %2846 = vmatprep.subr.bf16.mxu0 %v3369_v0 }
 0x344   :  { %2831 = vmatmul.mubr.msk.bf16.vlgmr.msra.gmra.mrb[4].mxu1 %vm538_vm2, %v3675_v49 }
 0x345   :  { %2842 = vmatprep.mubr.msk.bf16.mxu1 %vm3371_vm1, %v3369_v0 }
 0x346   :  { %2837 = vmatmul.mubr.msk.bf16.vlgmr.msra.gmra.mrb[16].mxu0 %vm538_vm2, %v3681_v52 }
 0x347   :  { %2848 = vmatprep.mubr.msk.bf16.mxu0 %vm3371_vm1, %v3369_v0 }
 0x3ae   :  { %v767_v55 = vpop.permute.xlu1 %766 }
 0x3af   :  { %2841 = vmatpush3.bf16.msra.mxu1 %v767_v55 }
 0x3b0   :  { %2852 = vmatprep.subr.bf16.mxu1 %v3369_v0 }
 0x40f   :  { %v579_v33 = vpop.f32.mrb[0].mxu1 }
 0x410   :  { %v2820_v56 = vpop.f32.mrb[1].mxu1  ;;  %v720_v57 = vsel %vm538_vm2, %v579_v33, -inf }
 0x411   :  { %v582_v37 = vpop.f32.mrb[2].mxu1  ;;  %v628_v58 = vpop.f32.mrb[12].mxu0  ;;  %721 = vmax.xlane.f32.xlu1 %v720_v57 }
 0x412   :  { %v2821_v59 = vpop.f32.mrb[3].mxu1  ;;  %v2826_v60 = vpop.f32.mrb[13].mxu0  ;;  %v723_v61 = vsel %vm538_vm2, %v628_v58, -inf }
 0x413   :  { %724 = vmax.xlane.f32.xlu0 %v723_v61  ;;  %v631_v62 = vpop.f32.mrb[14].mxu0 }
 0x414   :  { %v2827_v1 = vpop.f32.mrb[15].mxu0 }
 0x417   :  { %v671_v2 = vpop.f32.mrb[4].mxu1 }
 0x418   :  { %v2832_v4 = vpop.f32.mrb[5].mxu1  ;;  %v727_v5 = vsel %vm726_vm3, %v671_v2, -inf }
 0x419   :  { %v714_v6 = vpop.f32.mrb[16].mxu0  ;;  %728 = vmax.xlane.f32.xlu0 %v727_v5  ;;  %v674_v7 = vpop.f32.mrb[6].mxu1 }
 0x41a   :  { %v2833_v8 = vpop.f32.mrb[7].mxu1  ;;  %v2838_v9 = vpop.f32.mrb[17].mxu0  ;;  %v730_v13 = vsel %vm726_vm3, %v714_v6, -inf }
 0x41b   :  { %v717_v10 = vpop.f32.mrb[18].mxu0 }
 0x41c   :  { %v2839_v12 = vpop.f32.mrb[19].mxu0 }
 0x41d   :  { %731 = vmax.xlane.f32.xlu0 %v730_v13 }
 0x422   :  { %859 = vrot.lane.b32.xlu1 %v3662_v27, %s3365_s0 }
 0x426   :  { %908 = vrot.lane.b32.xlu1 %v3664_v30, %s3365_s0  ;;  %s3376_s0 = smov 56  }
 0x42a   :  { %965 = vrot.lane.b32.xlu1 %v3662_v27, %s3374_s18 }
 0x42e   :  { %963 = vrot.lane.b32.xlu1 %v3675_v49, %s3375_s8 }
 0x432   :  { %1064 = vrot.lane.b32.xlu1 %v3677_v50, %s3375_s8 }
 0x433   :  { %813 = vrot.lane.b32.xlu0 %v3679_v51, %s3372_s2 }
 0x436   :  { %1198 = vrot.lane.b32.xlu1 %v3677_v50, %s3374_s18 }
 0x437   :  { %1016 = vrot.lane.b32.xlu0 %v3664_v30, %s3374_s18 }
 0x43b   :  { %1014 = vrot.lane.b32.xlu0 %v3681_v52, %s3375_s8 }
 0x43f   :  { %1109 = vrot.lane.b32.xlu0 %v3679_v51, %s3375_s8 }
 0x49e   :  { %v722_v16 = vpop.xlane.xlu1 %721 }
 0x4a0   :  { %v725_v15 = vpop.xlane.xlu0 %724 }
 0x4a2   :  { %v860_v17 = vpop.permute.xlu1 %859 }
 0x4a3   :  { %v866_v35 = vsel %vm864_vm4, %v860_v17, 0 }
 0x4a6   :  { %v729_v19 = vpop.xlane.xlu0 %728  ;;  %v909_v34 = vpop.permute.xlu1 %908 }
 0x4a7   :  { %v733_v22 = vmax.f32 %v722_v16, %v729_v19  ;;  %v914_v39 = vsel %vm864_vm4, %v909_v34, 0 }
 0x4a9   :  { %v741_v11 = vsub.f32 %v671_v2, %v733_v22  ;;  %v735_v25 = vsub.f32 %v579_v33, %v733_v22 }
 0x4aa   :  { %v732_v23 = vpop.xlane.xlu0 %731  ;;  %v966_v40 = vpop.permute.xlu1 %965 }
 0x4ab   :  { %v743_v18 = vmul.f32 1.442695, %v741_v11  ;;  %v734_v21 = vmax.f32 %v725_v15, %v732_v23  ;;  %v737_v26 = vmul.f32 1.442695, %v735_v25  ;;  %v971_v42 = vsel %vm538_vm2, %v966_v40, 0 }
 0x4ad   :  { %v742_v24 = vsub.f32 %v714_v6, %v734_v21  ;;  %3141 = vpow2.f32 %v743_v18  ;;  %v736_v28 = vsub.f32 %v628_v58, %v734_v21 }
 0x4ae   :  { %v814_v14 = vpop.permute.xlu0 %813  ;;  %v964_v46 = vpop.permute.xlu1 %963 }
 0x4af   :  { %v745_v20 = vmul.f32 1.442695, %v742_v24  ;;  %2847 = vmatpush3.bf16.msra.mxu0 %v814_v14  ;;  %v739_v31 = vmul.f32 1.442695, %v736_v28 }
 0x4b0   :  { %2858 = vmatprep.subr.bf16.mxu0 %v3369_v0 }
 0x4b1   :  { %3143 = vpow2.f32 %v745_v20 }
 0x4b2   :  { %3145 = vpow2.f32 %v737_v26  ;;  %v1017_v43 = vpop.permute.xlu0 %1016  ;;  %v1065_v55 = vpop.permute.xlu1 %1064 }
 0x4b3   :  { %3147 = vpow2.f32 %v739_v31  ;;  %v1022_v54 = vsel %vm538_vm2, %v1017_v43, 0  ;;  %v1067_v33 = vsel %vm538_vm2, %v1065_v55, 0 }
 0x4b6   :  { %v1015_v53 = vpop.permute.xlu0 %1014  ;;  %v1199_v37 = vpop.permute.xlu1 %1198 }
 0x4b7   :  { %v3729_v29 = vpop.eup %3141 }
 0x4b8   :  { %v763_v32 = vpack.c.bf16 %v3729_v29, %v3729_v29 }
 0x4ba   :  { %2843 = vmatmul.mubr.msk.bf16.vlgmr.msra.gmra.mrb[8].mxu1 %vm726_vm3, %v763_v32  ;;  %v1110_v56 = vpop.permute.xlu0 %1109 }
 0x4bb   :  { %v3735_v36 = vpop.eup %3143  ;;  %2853 = vmatpush3.bf16.msra.mxu1 %v866_v35  ;;  %2854 = vmatprep.mubr.msk.bf16.mxu1 %vm3371_vm1, %v3369_v0  ;;  %v1112_v57 = vsel %vm538_vm2, %v1110_v56, 0 }
 0x4bc   :  { %v764_v38 = vpack.c.bf16 %v3735_v36, %v3735_v36  ;;  %2864 = vmatprep.subr.bf16.mxu1 %v3369_v0  ;;  %v3747_v41 = vpop.eup %3145 }
 0x4bd   :  { %v761_v44 = vpack.c.bf16 %v3747_v41, %v3747_v41  ;;  %v3751_v45 = vpop.eup %3147 }
 0x4be   :  { %2849 = vmatmul.mubr.msk.bf16.vlgmr.msra.gmra.mrb[20].mxu0 %vm726_vm3, %v764_v38  ;;  %v762_v48 = vpack.c.bf16 %v3751_v45, %v3751_v45 }
 0x4bf   :  { %2859 = vmatpush3.bf16.msra.mxu0 %v914_v39  ;;  %2860 = vmatprep.mubr.msk.bf16.mxu0 %vm3371_vm1, %v3369_v0 }
 0x4c0   :  { %2870 = vmatprep.subr.bf16.mxu0 %v3369_v0 }
 0x4c6   :  { %2855 = vmatmul.mubr.msk.bf16.vlgmr.msra.gmra.mrb[8].mxu1 %vm538_vm2, %v761_v44 }
 0x4c7   :  { %2865 = vmatpush3.bf16.xpose.msra.mxu1 %v971_v42  ;;  %2866 = vmatprep.mubr.msk.bf16.mxu1 %vm3371_vm1, %v3369_v0 }
 0x4c8   :  { %2876 = vmatprep.subr.bf16.mxu1 %v3369_v0 }
 0x4ca   :  { %2861 = vmatmul.mubr.msk.bf16.vlgmr.msra.gmra.mrb[20].mxu0 %vm538_vm2, %v762_v48 }
 0x4cb   :  { %2871 = vmatpush3.bf16.xpose.msra.mxu0 %v1022_v54  ;;  %2872 = vmatprep.mubr.msk.bf16.mxu0 %vm3371_vm1, %v3369_v0 }
 0x4cc   :  { %2882 = vmatprep.subr.bf16.mxu0 %v3369_v0 }
 0x4ce   :  { %2867 = vmatmul.mubr.msk.bf16.vlgmr.msra.gmra.mrb[12].mxu1 %vm538_vm2, %v964_v46 }
 0x4cf   :  { %2877 = vmatpush3.bf16.xpose.msra.mxu1 %v1067_v33  ;;  %2878 = vmatprep.mubr.msk.bf16.mxu1 %vm3371_vm1, %v3369_v0 }
 0x4d0   :  { %2888 = vmatprep.subr.bf16.mxu1 %v3369_v0 }
 0x4d2   :  { %2873 = vmatmul.mubr.msk.bf16.vlgmr.msra.gmra.mrb[24].mxu0 %vm538_vm2, %v1015_v53 }
 0x4d3   :  { %2883 = vmatpush3.bf16.xpose.msra.mxu0 %v1112_v57  ;;  %2884 = vmatprep.mubr.msk.bf16.mxu0 %vm3371_vm1, %v3369_v0 }
 0x4d4   :  { %2894 = vmatprep.subr.bf16.mxu0 %v3369_v0 }
 0x4d6   :  { %2879 = vmatmul.mubr.msk.bf16.vlgmr.msra.gmra.mrb[16].mxu1 %vm538_vm2, %v964_v46 }
 0x4d7   :  { %2889 = vmatpush3.bf16.msra.mxu1 %v1199_v37  ;;  %2890 = vmatprep.mubr.msk.bf16.mxu1 %vm3371_vm1, %v3369_v0 }
 0x4d8   :  { %2900 = vmatprep.subr.bf16.mxu1 %v3369_v0 }
 0x4da   :  { %2885 = vmatmul.mubr.msk.bf16.vlgmr.msra.gmra.mrb[28].mxu0 %vm538_vm2, %v1015_v53 }
 0x4db   :  { %2896 = vmatprep.mubr.msk.bf16.mxu0 %vm3371_vm1, %v3369_v0 }
 0x599   :  { %v3782_v58 = vpop.f32.mrb[8].mxu1 }
 0x59a   :  { %v2856_v59 = vpop.f32.mrb[9].mxu1 }
 0x59b   :  { %v905_v60 = vpop.f32.mrb[10].mxu1 }
 0x59c   :  { %v2857_v61 = vpop.f32.mrb[11].mxu1 }
 0x59d   :  { %v3784_v62 = vpop.f32.mrb[20].mxu0 }
 0x59e   :  { %v2862_v1 = vpop.f32.mrb[21].mxu0 }
 0x59f   :  { %v953_v2 = vpop.f32.mrb[22].mxu0 }
 0x5a0   :  { %v2863_v4 = vpop.f32.mrb[23].mxu0 }
 0x5a1   :  { %v1007_v5 = vpop.f32.mrb[12].mxu1 }
 0x5a2   :  { %v2868_v6 = vpop.f32.mrb[13].mxu1  ;;  %v1154_v7 = vsel %vm538_vm2, %v1007_v5, -inf }
 0x5a3   :  { %1155 = vmax.xlane.f32.xlu1 %v1154_v7  ;;  %v1010_v8 = vpop.f32.mrb[14].mxu1 }
 0x5a4   :  { %v2869_v9 = vpop.f32.mrb[15].mxu1 }
 0x5a5   :  { %v1058_v10 = vpop.f32.mrb[24].mxu0 }
 0x5a6   :  { %v2874_v12 = vpop.f32.mrb[25].mxu0  ;;  %v1157_v13 = vsel %vm538_vm2, %v1058_v10, -inf }
 0x5a7   :  { %1158 = vmax.xlane.f32.xlu0 %v1157_v13  ;;  %v1061_v15 = vpop.f32.mrb[26].mxu0 }
 0x5a8   :  { %v2875_v16 = vpop.f32.mrb[27].mxu0 }
 0x5a9   :  { %v1103_v19 = vpop.f32.mrb[16].mxu1 }
 0x5aa   :  { %v2880_v22 = vpop.f32.mrb[17].mxu1  ;;  %v1160_v11 = vsel %vm726_vm3, %v1103_v19, -inf }
 0x5ab   :  { %v1106_v23 = vpop.f32.mrb[18].mxu1  ;;  %1161 = vmax.xlane.f32.xlu0 %v1160_v11 }
 0x5ac   :  { %v2881_v18 = vpop.f32.mrb[19].mxu1 }
 0x5ad   :  { %v1148_v21 = vpop.f32.mrb[28].mxu0 }
 0x5ae   :  { %v2886_v24 = vpop.f32.mrb[29].mxu0  ;;  %v1163_v14 = vsel %vm726_vm3, %v1148_v21, -inf }
 0x5af   :  { %1164 = vmax.xlane.f32.xlu0 %v1163_v14  ;;  %v1151_v20 = vpop.f32.mrb[30].mxu0 }
 0x5b0   :  { %v2887_v25 = vpop.f32.mrb[31].mxu0 }
 0x5b4   :  { %1290 = vrot.lane.b32.xlu1 %v3662_v27, %s3376_s0 }
 0x5b8   :  { %1338 = vrot.lane.b32.xlu1 %v3664_v30, %s3376_s0 }
 0x5bc   :  { %1403 = vrot.lane.b32.xlu1 %v3662_v27, %s3377_s29 }
 0x5c0   :  { %1401 = vrot.lane.b32.xlu1 %v3675_v49, %s3378_s19 }
 0x5c4   :  { %1501 = vrot.lane.b32.xlu1 %v3677_v50, %s3378_s19 }
 0x5c5   :  { %1244 = vrot.lane.b32.xlu0 %v3679_v51, %s3374_s18 }
 0x5c8   :  { %1635 = vrot.lane.b32.xlu1 %v3677_v50, %s3377_s29 }
 0x5c9   :  { %1453 = vrot.lane.b32.xlu0 %v3664_v30, %s3377_s29 }
 0x5cd   :  { %1451 = vrot.lane.b32.xlu0 %v3681_v52, %s3378_s19 }
 0x5d1   :  { %1546 = vrot.lane.b32.xlu0 %v3679_v51, %s3378_s19 }
 0x630   :  { %v1156_v26 = vpop.xlane.xlu1 %1155 }
 0x634   :  { %v1159_v17 = vpop.xlane.xlu0 %1158  ;;  %v1291_v46 = vpop.permute.xlu1 %1290 }
 0x635   :  { %v1296_v56 = vsel %vm864_vm4, %v1291_v46, 0 }
 0x638   :  { %v1162_v28 = vpop.xlane.xlu0 %1161  ;;  %v1339_v33 = vpop.permute.xlu1 %1338 }
 0x639   :  { %v1166_v31 = vmax.f32 %v1156_v26, %v1162_v28  ;;  %v1344_v59 = vsel %vm864_vm4, %v1339_v33, 0 }
 0x63b   :  { %v1174_v32 = vsub.f32 %v1103_v19, %v1166_v31  ;;  %v1168_v44 = vsub.f32 %v1007_v5, %v1166_v31 }
 0x63c   :  { %v1165_v34 = vpop.xlane.xlu0 %1164  ;;  %v1404_v60 = vpop.permute.xlu1 %1403 }
 0x63d   :  { %v1176_v35 = vmul.f32 1.442695, %v1174_v32  ;;  %v1167_v38 = vmax.f32 %v1159_v17, %v1165_v34  ;;  %v1170_v42 = vmul.f32 1.442695, %v1168_v44  ;;  %v1409_v6 = vsel %vm538_vm2, %v1404_v60, 0 }
 0x63f   :  { %v1175_v39 = vsub.f32 %v1148_v21, %v1167_v38  ;;  %3149 = vpow2.f32 %v1176_v35  ;;  %v1169_v48 = vsub.f32 %v1058_v10, %v1167_v38 }
 0x640   :  { %v1245_v40 = vpop.permute.xlu0 %1244  ;;  %v1402_v5 = vpop.permute.xlu1 %1401 }
 0x641   :  { %v1178_v43 = vmul.f32 1.442695, %v1175_v39  ;;  %2895 = vmatpush3.bf16.msra.mxu0 %v1245_v40  ;;  %v1172_v54 = vmul.f32 1.442695, %v1169_v48 }
 0x642   :  { %2906 = vmatprep.subr.bf16.mxu0 %v3369_v0 }
 0x643   :  { %3151 = vpow2.f32 %v1178_v43 }
 0x644   :  { %3153 = vpow2.f32 %v1170_v42  ;;  %v1454_v1 = vpop.permute.xlu0 %1453  ;;  %v1502_v10 = vpop.permute.xlu1 %1501 }
 0x645   :  { %3155 = vpow2.f32 %v1172_v54  ;;  %v1459_v9 = vsel %vm538_vm2, %v1454_v1, 0  ;;  %v1504_v12 = vsel %vm538_vm2, %v1502_v10, 0 }
 0x648   :  { %v1452_v8 = vpop.permute.xlu0 %1451  ;;  %v1636_v16 = vpop.permute.xlu1 %1635 }
 0x649   :  { %v3805_v53 = vpop.eup %3149 }
 0x64a   :  { %v1196_v55 = vpack.c.bf16 %v3805_v53, %v3805_v53 }
 0x64c   :  { %2891 = vmatmul.mubr.msk.bf16.vlgmr.msra.gmra.mrb[20].mxu1 %vm726_vm3, %v1196_v55  ;;  %v1547_v13 = vpop.permute.xlu0 %1546 }
 0x64d   :  { %v3811_v57 = vpop.eup %3151  ;;  %2901 = vmatpush3.bf16.msra.mxu1 %v1296_v56  ;;  %2902 = vmatprep.mubr.msk.bf16.mxu1 %vm3371_vm1, %v3369_v0  ;;  %v1549_v15 = vsel %vm538_vm2, %v1547_v13, 0 }
 0x64e   :  { %v1197_v37 = vpack.c.bf16 %v3811_v57, %v3811_v57  ;;  %2912 = vmatprep.subr.bf16.mxu1 %v3369_v0  ;;  %v3823_v61 = vpop.eup %3153 }
 0x64f   :  { %v1194_v2 = vpack.c.bf16 %v3823_v61, %v3823_v61  ;;  %v3827_v4 = vpop.eup %3155 }
 0x650   :  { %2897 = vmatmul.mubr.msk.bf16.vlgmr.msra.gmra.mrb[32].mxu0 %vm726_vm3, %v1197_v37  ;;  %v1195_v7 = vpack.c.bf16 %v3827_v4, %v3827_v4 }
 0x651   :  { %2907 = vmatpush3.bf16.msra.mxu0 %v1344_v59  ;;  %2908 = vmatprep.mubr.msk.bf16.mxu0 %vm3371_vm1, %v3369_v0 }
 0x652   :  { %2918 = vmatprep.subr.bf16.mxu0 %v3369_v0 }
 0x658   :  { %2903 = vmatmul.mubr.msk.bf16.vlgmr.msra.gmra.mrb[20].mxu1 %vm538_vm2, %v1194_v2 }
 0x659   :  { %2913 = vmatpush3.bf16.xpose.msra.mxu1 %v1409_v6  ;;  %2914 = vmatprep.mubr.msk.bf16.mxu1 %vm3371_vm1, %v3369_v0 }
 0x65a   :  { %2924 = vmatprep.subr.bf16.mxu1 %v3369_v0 }
 0x65c   :  { %2909 = vmatmul.mubr.msk.bf16.vlgmr.msra.gmra.mrb[32].mxu0 %vm538_vm2, %v1195_v7 }
 0x65d   :  { %2919 = vmatpush3.bf16.xpose.msra.mxu0 %v1459_v9  ;;  %2920 = vmatprep.mubr.msk.bf16.mxu0 %vm3371_vm1, %v3369_v0 }
 0x65e   :  { %2930 = vmatprep.subr.bf16.mxu0 %v3369_v0 }
 0x660   :  { %2915 = vmatmul.mubr.msk.bf16.vlgmr.msra.gmra.mrb[24].mxu1 %vm538_vm2, %v1402_v5 }
 0x661   :  { %2925 = vmatpush3.bf16.xpose.msra.mxu1 %v1504_v12  ;;  %2926 = vmatprep.mubr.msk.bf16.mxu1 %vm3371_vm1, %v3369_v0 }
 0x662   :  { %2936 = vmatprep.subr.bf16.mxu1 %v3369_v0 }
 0x664   :  { %2921 = vmatmul.mubr.msk.bf16.vlgmr.msra.gmra.mrb[36].mxu0 %vm538_vm2, %v1452_v8 }
 0x665   :  { %2931 = vmatpush3.bf16.xpose.msra.mxu0 %v1549_v15  ;;  %2932 = vmatprep.mubr.msk.bf16.mxu0 %vm3371_vm1, %v3369_v0 }
 0x666   :  { %2942 = vmatprep.subr.bf16.mxu0 %v3369_v0 }
 0x668   :  { %2927 = vmatmul.mubr.msk.bf16.vlgmr.msra.gmra.mrb[28].mxu1 %vm538_vm2, %v1402_v5 }
 0x669   :  { %2937 = vmatpush3.bf16.msra.mxu1 %v1636_v16  ;;  %2938 = vmatprep.mubr.msk.bf16.mxu1 %vm3371_vm1, %v3369_v0 }
 0x66a   :  { %2948 = vmatprep.subr.bf16.mxu1 %v3369_v0 }
 0x66c   :  { %2933 = vmatmul.mubr.msk.bf16.vlgmr.msra.gmra.mrb[40].mxu0 %vm538_vm2, %v1452_v8 }
 0x66d   :  { %2944 = vmatprep.mubr.msk.bf16.mxu0 %vm3371_vm1, %v3369_v0 }
 0x72b   :  { %v3858_v19 = vpop.f32.mrb[20].mxu1 }
 0x72c   :  { %v2904_v22 = vpop.f32.mrb[21].mxu1 }
 0x72d   :  { %v1335_v11 = vpop.f32.mrb[22].mxu1 }
 0x72e   :  { %v2905_v23 = vpop.f32.mrb[23].mxu1 }
 0x72f   :  { %v3860_v18 = vpop.f32.mrb[32].mxu0 }
 0x730   :  { %v2910_v21 = vpop.f32.mrb[33].mxu0 }
 0x731   :  { %v1383_v24 = vpop.f32.mrb[34].mxu0 }
 0x732   :  { %v2911_v14 = vpop.f32.mrb[35].mxu0 }
 0x733   :  { %v1445_v20 = vpop.f32.mrb[24].mxu1 }
 0x734   :  { %v2916_v25 = vpop.f32.mrb[25].mxu1  ;;  %v1591_v17 = vsel %vm538_vm2, %v1445_v20, -inf }
 0x735   :  { %1592 = vmax.xlane.f32.xlu1 %v1591_v17  ;;  %v1448_v26 = vpop.f32.mrb[26].mxu1 }
 0x736   :  { %v2917_v28 = vpop.f32.mrb[27].mxu1 }
 0x737   :  { %v1495_v31 = vpop.f32.mrb[36].mxu0 }
 0x738   :  { %v2922_v32 = vpop.f32.mrb[37].mxu0  ;;  %v1594_v34 = vsel %vm538_vm2, %v1495_v31, -inf }
 0x739   :  { %1595 = vmax.xlane.f32.xlu0 %v1594_v34  ;;  %v1498_v35 = vpop.f32.mrb[38].mxu0 }
 0x73a   :  { %v2923_v38 = vpop.f32.mrb[39].mxu0 }
 0x73b   :  { %v1540_v39 = vpop.f32.mrb[28].mxu1 }
 0x73c   :  { %v2928_v40 = vpop.f32.mrb[29].mxu1  ;;  %v1597_v43 = vsel %vm726_vm3, %v1540_v39, -inf }
 0x73d   :  { %v1543_v44 = vpop.f32.mrb[30].mxu1  ;;  %1598 = vmax.xlane.f32.xlu0 %v1597_v43 }
 0x73e   :  { %v2929_v46 = vpop.f32.mrb[31].mxu1 }
 0x73f   :  { %v1585_v42 = vpop.f32.mrb[40].mxu0 }
 0x740   :  { %v2934_v48 = vpop.f32.mrb[41].mxu0  ;;  %v1600_v54 = vsel %vm726_vm3, %v1585_v42, -inf }
 0x741   :  { %1601 = vmax.xlane.f32.xlu0 %v1600_v54  ;;  %v1588_v55 = vpop.f32.mrb[42].mxu0 }
 0x742   :  { %v2935_v33 = vpop.f32.mrb[43].mxu0 }
 0x746   :  { %1727 = vrot.lane.b32.xlu1 %v3662_v27, %s3379_s5 }
 0x74a   :  { %1775 = vrot.lane.b32.xlu1 %v3664_v30, %s3379_s5 }
 0x74e   :  { %1840 = vrot.lane.b32.xlu1 %v3662_v27, %s3380_s14 }
 0x752   :  { %1838 = vrot.lane.b32.xlu1 %v3675_v49, %s3381_s20 }
 0x756   :  { %1938 = vrot.lane.b32.xlu1 %v3677_v50, %s3381_s20 }
 0x757   :  { %1681 = vrot.lane.b32.xlu0 %v3679_v51, %s3377_s29 }
 0x75b   :  { %1890 = vrot.lane.b32.xlu0 %v3664_v30, %s3380_s14 }
 0x75f   :  { %1888 = vrot.lane.b32.xlu0 %v3681_v52, %s3381_s20 }
 0x763   :  { %1983 = vrot.lane.b32.xlu0 %v3679_v51, %s3381_s20 }
 0x7c2   :  { %v1593_v37 = vpop.xlane.xlu1 %1592 }
 0x7c6   :  { %v1596_v56 = vpop.xlane.xlu0 %1595  ;;  %v1728_v52 = vpop.permute.xlu1 %1727 }
 0x7c7   :  { %v1733_v11 = vsel %vm864_vm4, %v1728_v52, 0 }
 0x7ca   :  { %v1599_v59 = vpop.xlane.xlu0 %1598  ;;  %v1776_v22 = vpop.permute.xlu1 %1775 }
 0x7cb   :  { %v1603_v60 = vmax.f32 %v1593_v37, %v1599_v59  ;;  %v1781_v24 = vsel %vm864_vm4, %v1776_v22, 0 }
 0x7cd   :  { %v1611_v1 = vsub.f32 %v1540_v39, %v1603_v60  ;;  %v1605_v9 = vsub.f32 %v1445_v20, %v1603_v60 }
 0x7ce   :  { %v1602_v2 = vpop.xlane.xlu0 %1601  ;;  %v1841_v14 = vpop.permute.xlu1 %1840 }
 0x7cf   :  { %v1613_v5 = vmul.f32 1.442695, %v1611_v1  ;;  %v1604_v49 = vmax.f32 %v1596_v56, %v1602_v2  ;;  %v1607_v10 = vmul.f32 1.442695, %v1605_v9 }
 0x7d1   :  { %v1612_v6 = vsub.f32 %v1585_v42, %v1604_v49  ;;  %3157 = vpow2.f32 %v1613_v5  ;;  %v1606_v12 = vsub.f32 %v1495_v31, %v1604_v49  ;;  %v1846_v31 = vsel %vm538_vm2, %v1841_v14, 0 }
 0x7d2   :  { %v1682_v7 = vpop.permute.xlu0 %1681  ;;  %v1839_v28 = vpop.permute.xlu1 %1838  ;;  %v1180_v14 = vsel %vm538_vm2, %v3823_v61, 0.0 }
 0x7d3   :  { %v1615_v8 = vmul.f32 1.442695, %v1612_v6  ;;  %2943 = vmatpush3.bf16.msra.mxu0 %v1682_v7  ;;  %v1609_v15 = vmul.f32 1.442695, %v1606_v12 }
 0x7d4   :  { %2954 = vmatprep.subr.bf16.mxu0 %v3369_v0 }
 0x7d5   :  { %3159 = vpow2.f32 %v1615_v8 }
 0x7d6   :  { %3161 = vpow2.f32 %v1607_v10  ;;  %v1891_v25 = vpop.permute.xlu0 %1890  ;;  %v1939_v38 = vpop.permute.xlu1 %1938 }
 0x7d7   :  { %3163 = vpow2.f32 %v1609_v15  ;;  %v1896_v35 = vsel %vm538_vm2, %v1891_v25, 0  ;;  %v1941_v39 = vsel %vm538_vm2, %v1939_v38, 0 }
 0x7da   :  { %v1889_v34 = vpop.permute.xlu0 %1888 }
 0x7db   :  { %v3879_v13 = vpop.eup %3157 }
 0x7dc   :  { %v1633_v16 = vpack.c.bf16 %v3879_v13, %v3879_v13 }
 0x7de   :  { %2939 = vmatmul.mubr.msk.bf16.vlgmr.msra.gmra.mrb[32].mxu1 %vm726_vm3, %v1633_v16  ;;  %v1984_v40 = vpop.permute.xlu0 %1983 }
 0x7df   :  { %v3885_v23 = vpop.eup %3159  ;;  %2949 = vmatpush3.bf16.msra.mxu1 %v1733_v11  ;;  %2950 = vmatprep.mubr.msk.bf16.mxu1 %vm3371_vm1, %v3369_v0  ;;  %v1986_v43 = vsel %vm538_vm2, %v1984_v40, 0 }
 0x7e0   :  { %v1634_v21 = vpack.c.bf16 %v3885_v23, %v3885_v23  ;;  %2960 = vmatprep.subr.bf16.mxu1 %v3369_v0  ;;  %v3897_v20 = vpop.eup %3161  ;;  %v1626_v61 = vsel %vm726_vm3, %v3885_v23, 0.0 }
 0x7e1   :  { %v1631_v17 = vpack.c.bf16 %v3897_v20, %v3897_v20  ;;  %v3901_v26 = vpop.eup %3163  ;;  %v1617_v25 = vsel %vm538_vm2, %v3897_v20, 0.0 }
 0x7e2   :  { %2945 = vmatmul.mubr.msk.bf16.vlgmr.msra.gmra.mrb[44].mxu0 %vm726_vm3, %v1634_v21  ;;  %v1632_v32 = vpack.c.bf16 %v3901_v26, %v3901_v26 }
 0x7e3   :  { %2955 = vmatpush3.bf16.msra.mxu0 %v1781_v24  ;;  %2956 = vmatprep.mubr.msk.bf16.mxu0 %vm3371_vm1, %v3369_v0 }
 0x7e4   :  { %2966 = vmatprep.subr.bf16.mxu0 %v3369_v0 }
 0x7ea   :  { %2951 = vmatmul.mubr.msk.bf16.vlgmr.msra.gmra.mrb[32].mxu1 %vm538_vm2, %v1631_v17  ;;  %v1183_v17 = vsel %vm538_vm2, %v3827_v4, 0.0 }
 0x7eb   :  { %2961 = vmatpush3.bf16.xpose.msra.mxu1 %v1846_v31  ;;  %2962 = vmatprep.mubr.msk.bf16.mxu1 %vm3371_vm1, %v3369_v0 }
 0x7ec   :  { %2972 = vmatprep.subr.bf16.mxu1 %v3369_v0 }
 0x7ee   :  { %2957 = vmatmul.mubr.msk.bf16.vlgmr.msra.gmra.mrb[44].mxu0 %vm538_vm2, %v1632_v32 }
 0x7ef   :  { %2967 = vmatpush3.bf16.xpose.msra.mxu0 %v1896_v35  ;;  %2968 = vmatprep.mubr.msk.bf16.mxu0 %vm3371_vm1, %v3369_v0 }
 0x7f0   :  { %2978 = vmatprep.subr.bf16.mxu0 %v3369_v0 }
 0x7f2   :  { %2963 = vmatmul.mubr.msk.bf16.vlgmr.msra.gmra.mrb[36].mxu1 %vm538_vm2, %v1839_v28 }
 0x7f3   :  { %2973 = vmatpush3.bf16.xpose.msra.mxu1 %v1941_v39  ;;  %2974 = vmatprep.mubr.msk.bf16.mxu1 %vm3371_vm1, %v3369_v0 }
 0x7f4   :  { %2984 = vmatprep.subr.bf16.mxu1 %v3369_v0 }
 0x7f6   :  { %2969 = vmatmul.mubr.msk.bf16.vlgmr.msra.gmra.mrb[48].mxu0 %vm538_vm2, %v1889_v34 }
 0x7f7   :  { %2979 = vmatpush3.bf16.xpose.msra.mxu0 %v1986_v43  ;;  %2980 = vmatprep.mubr.msk.bf16.mxu0 %vm3371_vm1, %v3369_v0 }
 0x7f8   :  { %2990 = vmatprep.subr.bf16.mxu0 %v3369_v0 }
 0x7fa   :  { %2975 = vmatmul.mubr.msk.bf16.vlgmr.msra.gmra.mrb[40].mxu1 %vm538_vm2, %v1839_v28 }
 0x7fb   :  { %2986 = vmatprep.mubr.msk.bf16.mxu1 %vm3371_vm1, %v3369_v0 }
 0x7fe   :  { %2981 = vmatmul.mubr.msk.bf16.vlgmr.msra.gmra.mrb[52].mxu0 %vm538_vm2, %v1889_v34 }
 0x7ff   :  { %2992 = vmatprep.mubr.msk.bf16.mxu0 %vm3371_vm1, %v3369_v0 }
 0x8bd   :  { %v3931_v44 = vpop.f32.mrb[32].mxu1 }
 0x8be   :  { %v2952_v46 = vpop.f32.mrb[33].mxu1 }
 0x8bf   :  { %v1772_v42 = vpop.f32.mrb[34].mxu1 }
 0x8c0   :  { %v2953_v48 = vpop.f32.mrb[35].mxu1 }
 0x8c1   :  { %v3933_v54 = vpop.f32.mrb[44].mxu0 }
 0x8c2   :  { %v2958_v55 = vpop.f32.mrb[45].mxu0 }
 0x8c3   :  { %v1820_v33 = vpop.f32.mrb[46].mxu0 }
 0x8c4   :  { %v2959_v56 = vpop.f32.mrb[47].mxu0 }
 0x8c5   :  { %v1882_v37 = vpop.f32.mrb[36].mxu1 }
 0x8c6   :  { %v2964_v59 = vpop.f32.mrb[37].mxu1  ;;  %v2028_v60 = vsel %vm538_vm2, %v1882_v37, -inf }
 0x8c7   :  { %2029 = vmax.xlane.f32.xlu1 %v2028_v60  ;;  %v1885_v1 = vpop.f32.mrb[38].mxu1 }
 0x8c8   :  { %v2965_v2 = vpop.f32.mrb[39].mxu1 }
 0x8c9   :  { %v1932_v5 = vpop.f32.mrb[48].mxu0 }
 0x8ca   :  { %v2970_v49 = vpop.f32.mrb[49].mxu0  ;;  %v2031_v6 = vsel %vm538_vm2, %v1932_v5, -inf }
 0x8cb   :  { %2032 = vmax.xlane.f32.xlu0 %v2031_v6  ;;  %v1935_v7 = vpop.f32.mrb[50].mxu0  ;;  %v747_v6 = vsel %vm538_vm2, %v3747_v41, 0.0  ;;  %v756_v41 = vsel %vm726_vm3, %v3735_v36, 0.0 }
 0x8cc   :  { %v2971_v8 = vpop.f32.mrb[51].mxu0 }
 0x8cd   :  { %v1977_v9 = vpop.f32.mrb[40].mxu1  ;;  %v753_v8 = vsel %vm726_vm3, %v3729_v29, 0.0 }
 0x8ce   :  { %v2976_v52 = vpop.f32.mrb[41].mxu1  ;;  %v2034_v10 = vsel %vm726_vm3, %v1977_v9, -inf }
 0x8cf   :  { %v1980_v12 = vpop.f32.mrb[42].mxu1  ;;  %2035 = vmax.xlane.f32.xlu0 %v2034_v10 }
 0x8d0   :  { %v2977_v15 = vpop.f32.mrb[43].mxu1 }
 0x8d1   :  { %v2022_v16 = vpop.f32.mrb[52].mxu0 }
 0x8d2   :  { %v2982_v22 = vpop.f32.mrb[53].mxu0  ;;  %v2037_v11 = vsel %vm726_vm3, %v2022_v16, -inf }
 0x8d3   :  { %2038 = vmax.xlane.f32.xlu0 %v2037_v11  ;;  %v2025_v21 = vpop.f32.mrb[54].mxu0 }
 0x8d4   :  { %v2983_v24 = vpop.f32.mrb[55].mxu0 }
 0x8d8   :  { %2072 = vrot.lane.b32.xlu1 %v3677_v50, %s3380_s14  ;;  %v1189_v50 = vsel %vm726_vm3, %v3811_v57, 0.0 }
 0x8dc   :  { %2164 = vrot.lane.b32.xlu1 %v3662_v27, %s3382_s21  ;;  %v1623_v27 = vsel %vm726_vm3, %v3879_v13, 0.0 }
 0x8e0   :  { %2212 = vrot.lane.b32.xlu1 %v3664_v30, %s3382_s21  ;;  %v1186_v30 = vsel %vm726_vm3, %v3805_v53, 0.0 }
 0x8e9   :  { %2118 = vrot.lane.b32.xlu0 %v3679_v51, %s3380_s14  ;;  %v1620_v51 = vsel %vm538_vm2, %v3901_v26, 0.0 }
 0x904   :  { %1181 = vadd.xlane.f32.xlu1 %v1180_v14 }
 0x908   :  { %1618 = vadd.xlane.f32.xlu1 %v1617_v25  ;;  %1184 = vadd.xlane.f32.xlu0 %v1183_v17 }
 0x90c   :  { %1624 = vadd.xlane.f32.xlu1 %v1623_v27  ;;  %1187 = vadd.xlane.f32.xlu0 %v1186_v30 }
 0x910   :  { %1190 = vadd.xlane.f32.xlu0 %v1189_v50 }
 0x914   :  { %1621 = vadd.xlane.f32.xlu0 %v1620_v51 }
 0x918   :  { %1627 = vadd.xlane.f32.xlu0 %v1626_v61 }
 0x954   :  { %v2030_v4 = vpop.xlane.xlu1 %2029 }
 0x958   :  { %v2073_v20 = vpop.permute.xlu1 %2072  ;;  %v2033_v13 = vpop.xlane.xlu0 %2032 }
 0x959   :  { %2985 = vmatpush3.bf16.msra.mxu1 %v2073_v20 }
 0x95a   :  { %2996 = vmatprep.subr.bf16.mxu1 %v3369_v0 }
 0x95c   :  { %v2036_v53 = vpop.xlane.xlu0 %2035  ;;  %v2165_v46 = vpop.permute.xlu1 %2164 }
 0x95d   :  { %v2040_v28 = vmax.f32 %v2030_v4, %v2036_v53 }
 0x95f   :  { %v2042_v31 = vsub.f32 %v1882_v37, %v2040_v28  ;;  %v2048_v32 = vsub.f32 %v1977_v9, %v2040_v28  ;;  %v2170_v37 = vsel %vm864_vm4, %v2165_v46, 0  ;;  %v750_v9 = vsel %vm538_vm2, %v3751_v45, 0.0 }
 0x960   :  { %v2039_v57 = vpop.xlane.xlu0 %2038  ;;  %v2213_v60 = vpop.permute.xlu1 %2212 }
 0x961   :  { %v2044_v34 = vmul.f32 1.442695, %v2042_v31  ;;  %v2050_v35 = vmul.f32 1.442695, %v2048_v32  ;;  %v2041_v38 = vmax.f32 %v2033_v13, %v2039_v57  ;;  %v2218_v49 = vsel %vm864_vm4, %v2213_v60, 0 }
 0x963   :  { %3165 = vpow2.f32 %v2044_v34  ;;  %v2043_v26 = vsub.f32 %v1932_v5, %v2041_v38  ;;  %v2049_v39 = vsub.f32 %v2022_v16, %v2041_v38 }
 0x964   :  { %3167 = vpow2.f32 %v2050_v35  ;;  %v2119_v23 = vpop.permute.xlu0 %2118 }
 0x965   :  { %v2046_v40 = vmul.f32 1.442695, %v2043_v26  ;;  %v2052_v43 = vmul.f32 1.442695, %v2049_v39  ;;  %2991 = vmatpush3.bf16.msra.mxu0 %v2119_v23 }
 0x966   :  { %3002 = vmatprep.subr.bf16.mxu0 %v3369_v0 }
 0x967   :  { %3169 = vpow2.f32 %v2046_v40 }
 0x968   :  { %3171 = vpow2.f32 %v2052_v43 }
 0x96d   :  { %v3166_v42 = vpop.eup %3165 }
 0x96e   :  { %v3168_v48 = vpop.eup %3167  ;;  %v2054_v55 = vsel %vm538_vm2, %v3166_v42, 0.0  ;;  %v2068_v52 = vpack.c.bf16 %v3166_v42, %v3166_v42 }
 0x96f   :  { %2055 = vadd.xlane.f32.xlu1 %v2054_v55  ;;  %v2070_v33 = vpack.c.bf16 %v3168_v48, %v3168_v48  ;;  %v2060_v1 = vsel %vm726_vm3, %v3168_v48, 0.0  ;;  %v3114_v48 = vld [vmem:[#allocation11 + $0x8] sm:$0xff]  }
 0x971   :  { %v3170_v56 = vpop.eup %3169  ;;  %2987 = vmatmul.mubr.msk.bf16.vlgmr.msra.gmra.mrb[44].mxu1 %vm726_vm3, %v2070_v33 }
 0x972   :  { %v3172_v59 = vpop.eup %3171  ;;  %2997 = vmatpush3.bf16.msra.mxu1 %v2170_v37  ;;  %v2057_v2 = vsel %vm538_vm2, %v3170_v56, 0.0  ;;  %2998 = vmatprep.mubr.msk.bf16.mxu1 %vm3371_vm1, %v3369_v0  ;;  %v2069_v10 = vpack.c.bf16 %v3170_v56, %v3170_v56 }
 0x973   :  { %2061 = vadd.xlane.f32.xlu1 %v2060_v1  ;;  %2058 = vadd.xlane.f32.xlu0 %v2057_v2  ;;  %v2071_v5 = vpack.c.bf16 %v3172_v59, %v3172_v59  ;;  %v2063_v7 = vsel %vm726_vm3, %v3172_v59, 0.0 }
 0x974   :  { %3008 = vmatprep.subr.bf16.mxu1 %v3369_v0 }
 0x975   :  { %2993 = vmatmul.mubr.msk.bf16.vlgmr.msra.gmra.mrb[56].mxu0 %vm726_vm3, %v2071_v5 }
 0x976   :  { %3003 = vmatpush3.bf16.msra.mxu0 %v2218_v49  ;;  %3004 = vmatprep.mubr.msk.bf16.mxu0 %vm3371_vm1, %v3369_v0 }
 0x977   :  { %748 = vadd.xlane.f32.xlu1 %v747_v6  ;;  %2064 = vadd.xlane.f32.xlu0 %v2063_v7 }
 0x978   :  { %3016 = vmatprep.subr.bf16.mxu0 %v3369_v0 }
 0x97b   :  { %754 = vadd.xlane.f32.xlu1 %v753_v8  ;;  %751 = vadd.xlane.f32.xlu0 %v750_v9 }
 0x97d   :  { %2999 = vmatmul.mubr.msk.bf16.vlgmr.msra.gmra.mrb[44].mxu1 %vm538_vm2, %v2068_v52 }
 0x97e   :  { %3012 = vmatprep.mubr.msk.bf16.mxu1 %vm3371_vm1, %v3369_v0 }
 0x97f   :  { %757 = vadd.xlane.f32.xlu0 %v756_v41 }
 0x981   :  { %3005 = vmatmul.mubr.msk.bf16.vlgmr.msra.gmra.mrb[56].mxu0 %vm538_vm2, %v2069_v10  ;;  %v2692_v10 = vld [vmem:[#allocation12] ss:$0 sm:$0xff] }
 0x982   :  { %3020 = vmatprep.mubr.msk.bf16.mxu0 %vm3371_vm1, %v3369_v0 }
 0x991   :  { %v1182_v29 = vpop.xlane.xlu1 %1181 }
 0x995   :  { %v1619_v45 = vpop.xlane.xlu1 %1618  ;;  %v1185_v12 = vpop.xlane.xlu0 %1184 }
 0x999   :  { %v1625_v15 = vpop.xlane.xlu1 %1624  ;;  %v1188_v16 = vpop.xlane.xlu0 %1187 }
 0x99a   :  { %v1192_v22 = vadd.f32 %v1188_v16, %v1182_v29  ;;  %v1629_v11 = vadd.f32 %v1625_v15, %v1619_v45  ;;  %v3193_v16 = vld [vmem:[%s4099_s1] sm:$0xff] }
 0x99c   :  { %3173 = vrcp.f32 %v1192_v22 }
 0x99d   :  { %v1191_v21 = vpop.xlane.xlu0 %1190  ;;  %3175 = vrcp.f32 %v1629_v11 }
 0x99e   :  { %v1193_v36 = vadd.f32 %v1191_v21, %v1185_v12 }
 0x9a0   :  { %3177 = vrcp.f32 %v1193_v36  ;;  %v3194_v36 = vld [vmem:[%s4099_s1 + $0x8] sm:$0xff] }
 0x9a1   :  { %v1622_v24 = vpop.xlane.xlu0 %1621 }
 0x9a5   :  { %v1628_v14 = vpop.xlane.xlu0 %1627 }
 0x9a6   :  { %v1630_v25 = vadd.f32 %v1628_v14, %v1622_v24  ;;  %v3174_v17 = vpop.eup %3173 }
 0x9a7   :  { %v1388_v27 = vmul.f32 %v3174_v17, %v3858_v19  ;;  %v3176_v30 = vpop.eup %3175  ;;  %v2404_v17 = vadd.f32 1.0, %v3611_v63 }
 0x9a8   :  { %3179 = vrcp.f32 %v1630_v25  ;;  %v1825_v61 = vmul.f32 %v3176_v30, %v3931_v44 }
 0x9a9   :  { %1392 = vrot.lane.b32.xlu1 %v1388_v27, %s3363_s28  ;;  %v2411_v27 = vrot.slane %v2404_v17, %v3604_v47 }
 0x9aa   :  { %v3178_v50 = vpop.eup %3177 }
 0x9ab   :  { %v1389_v51 = vmul.f32 %v3178_v50, %v3860_v18 }
 0x9ad   :  { %1394 = vrot.lane.b32.xlu0 %v1389_v51, %s3363_s28  ;;  %1829 = vrot.lane.b32.xlu1 %v1825_v61, %s3383_s22 }
 0x9b2   :  { %v3180_v4 = vpop.eup %3179 }
 0x9b3   :  { %v1826_v20 = vmul.f32 %v3180_v4, %v3933_v54 }
 0x9b5   :  { %1831 = vrot.lane.b32.xlu1 %v1826_v20, %s3383_s22 }
 0x9fc   :  { %v2056_v13 = vpop.xlane.xlu1 %2055 }
 0xa00   :  { %v2062_v53 = vpop.xlane.xlu1 %2061  ;;  %v2059_v28 = vpop.xlane.xlu0 %2058 }
 0xa01   :  { %v2066_v19 = vadd.f32 %v2062_v53, %v2056_v13 }
 0xa04   :  { %v749_v31 = vpop.xlane.xlu1 %748  ;;  %v2065_v32 = vpop.xlane.xlu0 %2064 }
 0xa05   :  { %v2067_v57 = vadd.f32 %v2065_v32, %v2059_v28 }
 0xa08   :  { %v755_v34 = vpop.xlane.xlu1 %754  ;;  %v752_v35 = vpop.xlane.xlu0 %751 }
 0xa09   :  { %v759_v18 = vadd.f32 %v755_v34, %v749_v31  ;;  %v2405_v31 = vadd.f32 1.0, %v3613_v3  ;;  %v3116_v34 = vld [vmem:[%s4107_s9 + $0x8] sm:$0xff]  }
 0xa0b   :  { %3181 = vrcp.f32 %v759_v18  ;;  %v2415_v32 = vrot.slane %v2405_v31, %v3604_v47  ;;  %v3118_v18 = vld [vmem:[%s4109_s11 + $0x8] sm:$0xff]  }
 0xa0c   :  { %v758_v44 = vpop.xlane.xlu0 %757 }
 0xa0d   :  { %v760_v38 = vadd.f32 %v758_v44, %v752_v35  ;;  %v3117_v35 = vld [vmem:[%s4109_s11] sm:$0xff]   ;;  %v3119_v44 = vld [vmem:[%s4109_s11 + $0x10] sm:$0xff]  }
 0xa0f   :  { %3183 = vrcp.f32 %v760_v38  ;;  %v3120_v38 = vld [vmem:[%s4109_s11 + $0x18] sm:$0xff]  }
 0xa10   :  { %3185 = vrcp.f32 %v2066_v19 }
 0xa11   :  { %3187 = vrcp.f32 %v2067_v57  ;;  %v3115_v57 = vld [vmem:[%s4107_s9] sm:$0xff]  }
 0xa12   :  { %3017 = vmatpush3.bf16.msra.mxu0 %v3115_v57 }
 0xa13   :  { %3018 = vmatprep.subr.bf16.mxu0 %v3369_v0 }
 0xa15   :  { %v3182_v26 = vpop.eup %3181 }
 0xa16   :  { %v958_v39 = vmul.f32 %v3182_v26, %v3782_v58  ;;  %v3113_v58 = vld [vmem:[#allocation11] sm:$0xff]   ;;  %3019 = vmatpush3.bf16.msra.mxu0 %v3116_v34 }
 0xa17   :  { %3009 = vmatpush3.bf16.msra.mxu1 %v3113_v58  ;;  %v3121_v26 = vld [vmem:[%s4109_s11 + $0x20] sm:$0xff]  }
 0xa18   :  { %960 = vst.msk [vmem:[#allocation2] sm:$0xff] %vm538_vm2, %v958_v39  ;;  %3010 = vmatprep.subr.bf16.mxu1 %v3369_v0 }
 0xa19   :  { %v3184_v54 = vpop.eup %3183 }
 0xa1a   :  { %v959_v23 = vmul.f32 %v3184_v54, %v3784_v62  ;;  %v3186_v55 = vpop.eup %3185 }
 0xa1b   :  { %v1393_v40 = vpop.permute.xlu1 %1392  ;;  %3011 = vmatpush3.bf16.msra.mxu1 %v3114_v48  ;;  %v3188_v60 = vpop.eup %3187 }
 0xa1c   :  { %961 = vst.msk [vmem:[#allocation2 + $0x8] sm:$0xff] %vm538_vm2, %v959_v23  ;;  %3024 = vmatprep.subr.bf16.mxu1 %v3369_v0 }
 0xa1d   :  { %1399 = vst.msk [vmem:[#allocation2] sm:$0xff] %vm1398_vm5, %v1393_v40 }
 0xa1f   :  { %v1395_v43 = vpop.permute.xlu0 %1394  ;;  %v1830_v46 = vpop.permute.xlu1 %1829 }
 0xa20   :  { %1400 = vst.msk [vmem:[#allocation2 + $0x8] sm:$0xff] %vm1398_vm5, %v1395_v43 }
 0xa21   :  { %1836 = vst.msk [vmem:[#allocation2] sm:$0xff] %vm1835_vm6, %v1830_v46 }
 0xa27   :  { %v1832_v42 = vpop.permute.xlu1 %1831 }
 0xa28   :  { %1837 = vst.msk [vmem:[#allocation2 + $0x8] sm:$0xff] %vm1835_vm6, %v1832_v42 }
 0xa50   :  { %v2206_v62 = vpop.f32.mrb[44].mxu1 }
 0xa51   :  { %v2262_v33 = vmul.f32 %v3186_v55, %v2206_v62  ;;  %v3000_v56 = vpop.f32.mrb[45].mxu1 }
 0xa52   :  { %v2209_v37 = vpop.f32.mrb[46].mxu1 }
 0xa53   :  { %v3001_v59 = vpop.f32.mrb[47].mxu1  ;;  %2266 = vrot.lane.b32.xlu1 %v2262_v33, %s3384_s23  ;;  %v2427_v37 = vrot.slane %v3611_v63, %v3604_v47  ;;  %v3123_v63 = vld [vmem:[%s4109_s11 + $0x30] sm:$0xff]  }
 0xa54   :  { %v2254_v1 = vpop.f32.mrb[56].mxu0  ;;  %v2431_v59 = vrot.slane %v3613_v3, %v3604_v47  ;;  %v3124_v47 = vld [vmem:[%s4109_s11 + $0x38] sm:$0xff]   ;;  %v2697_v3 = vld [vmem:[%s4108_s10] ss:$0 sm:$0xff]  ;;  %s3385_s10 = smov [#allocation14]  }
 0xa55   :  { %v2263_v2 = vmul.f32 %v3188_v60, %v2254_v1  ;;  %v3006_v5 = vpop.f32.mrb[57].mxu0 }
 0xa56   :  { %v2257_v49 = vpop.f32.mrb[58].mxu0 }
 0xa57   :  { %v3007_v6 = vpop.f32.mrb[59].mxu0  ;;  %2268 = vrot.lane.b32.xlu0 %v2263_v2, %s3384_s23  ;;  %v3122_v49 = vld [vmem:[%s4109_s11 + $0x28] sm:$0xff]   ;;  %s2636_s11 = sshll.u32 %s3385_s10, 4  ;;  %s2637_s11 = int_to_ptr.vmem [resolvable:$true] %s2636_s11 }
 0xa58   :  { %s3327_s15 = scalar_lea.vmem %s2637_s11, 256  ;;  %p3332_p7 = scmp.lt.s32.totalorder %s2637_s11, %s2637_s11 }
 0xa59   :  { %p3328_p6 = scmp.ne.s32.totalorder %s2637_s11, %s3327_s15  ;;  %p3333_p8 = scmp.lt.s32.totalorder %s3327_s15, %s3327_s15 }
 0xa5b   :  { %p3334_p9 = por %p3333_p8, %p3332_p7 }
 0xa5d   :  { %p3335_p10 = pnand %p3334_p9, %p3328_p6 }
 0xac5   :  { %v2267_v7 = vpop.permute.xlu1 %2266 }
 0xac6   :  { %2273 = vst.msk [vmem:[#allocation2] sm:$0xff] %vm2272_vm7, %v2267_v7 }
 0xac9   :  { %v2269_v8 = vpop.permute.xlu0 %2268 }
 0xaca   :  { %2274 = vst.msk [vmem:[#allocation2 + $0x8] sm:$0xff] %vm2272_vm7, %v2269_v8 }
 0xacd   :  { %v2275_v9 = vld [vmem:[#allocation2] sm:$0xff] }
 0xad1   :  { %v2276_v52 = vld [vmem:[#allocation2 + $0x8] sm:$0xff] }
 0xad2   :  { %v2712_v41 = vpack.c.bf16 %v2276_v52, %v2275_v9 }
 0xad4   :  { %3013 = vmatmul.mubr.msk.bf16.vlgmr.msra.gmra.mrb[48].mxu1 %vm156_vm0, %v2712_v41 }
 0xad5   :  { %3040 = vmatprep.mubr.msk.bf16.mxu1 %vm3371_vm1, %v3369_v0  ;;  %3025 = vmatpush3.bf16.msra.mxu1 %v3117_v35 }
 0xad6   :  { %3026 = vmatprep.subr.bf16.mxu1 %v3369_v0 }
 0xad9   :  { %3027 = vmatpush3.bf16.msra.mxu1 %v3118_v18 }
 0xada   :  { %3028 = vmatprep.subr.bf16.mxu1 %v3369_v0 }
 0xadd   :  { %3029 = vmatpush3.bf16.msra.mxu1 %v3119_v44 }
 0xade   :  { %3030 = vmatprep.subr.bf16.mxu1 %v3369_v0 }
 0xae1   :  { %3031 = vmatpush3.bf16.msra.mxu1 %v3120_v38 }
 0xae2   :  { %3032 = vmatprep.subr.bf16.mxu1 %v3369_v0 }
 0xae5   :  { %3033 = vmatpush3.bf16.msra.mxu1 %v3121_v26 }
 0xae6   :  { %3034 = vmatprep.subr.bf16.mxu1 %v3369_v0 }
 0xae9   :  { %3035 = vmatpush3.bf16.msra.mxu1 %v3122_v49 }
 0xaea   :  { %3036 = vmatprep.subr.bf16.mxu1 %v3369_v0 }
 0xaed   :  { %3037 = vmatpush3.bf16.msra.mxu1 %v3123_v63 }
 0xaee   :  { %3038 = vmatprep.subr.bf16.mxu1 %v3369_v0 }
 0xaf1   :  { %3039 = vmatpush3.bf16.msra.mxu1 %v3124_v47 }
 0xba7   :  { %v2344_v29 = vpop.f32.mrb[48].mxu1 }
 0xba8   :  { %v2345_v45 = vadd.f32 %v2692_v10, %v2344_v29  ;;  %v3014_v12 = vpop.f32.mrb[49].mxu1 }
 0xba9   :  { %v2347_v15 = vpop.f32.mrb[50].mxu1 }
 0xbaa   :  { %v4009_v22 = vadd.f32 %v3193_v16, %v2345_v45  ;;  %v2348_v11 = vadd.f32 %v2692_v10, %v2347_v15  ;;  %v3015_v21 = vpop.f32.mrb[51].mxu1  ;;  %v2702_v15 = vld [vmem:[%s4110_s12] ss:$0 sm:$0xff] }
 0xbac   :  { %v4014_v24 = vadd.f32 %v3194_v36, %v2348_v11  ;;  %v2353_v14 = vsel %vm156_vm0, %v4009_v22, 0.0 }
 0xbad   :  { %2354 = vadd.xlane.f32.xlu1 %v2353_v14 }
 0xbae   :  { %v2356_v25 = vsel %vm156_vm0, %v4014_v24, 0.0 }
 0xbaf   :  { %2357 = vadd.xlane.f32.xlu0 %v2356_v25 }
 0xbbe   :  { %2416 = vrot.lane.b32.xlu1 %v2411_v27, %s3372_s2 }
 0xc3a   :  { %v2355_v30 = vpop.xlane.xlu1 %2354 }
 0xc3b   :  { %v2359_v50 = vmul.f32 0.03125, %v2355_v30 }
 0xc3c   :  { %v2358_v51 = vpop.xlane.xlu0 %2357 }
 0xc3d   :  { %v2361_v61 = vsub.f32 %v4009_v22, %v2359_v50  ;;  %v2360_v4 = vmul.f32 0.03125, %v2358_v51 }
 0xc3e   :  { %v2417_v55 = vpop.permute.xlu1 %2416 }
 0xc3f   :  { %v2362_v20 = vsub.f32 %v4014_v24, %v2360_v4  ;;  %v2363_v13 = vmul.f32 %v2361_v61, %v2361_v61 }
 0xc41   :  { %v2365_v53 = vsel %vm156_vm0, %v2363_v13, 0.0  ;;  %v2364_v28 = vmul.f32 %v2362_v20, %v2362_v20 }
 0xc42   :  { %2366 = vadd.xlane.f32.xlu0 %v2365_v53 }
 0xc43   :  { %v2368_v19 = vsel %vm156_vm0, %v2364_v28, 0.0 }
 0xc46   :  { %2369 = vadd.xlane.f32.xlu0 %v2368_v19 }
 0xc5c   :  { %2418 = vrot.lane.b32.xlu0 %v2415_v32, %s3372_s2 }
 0xccf   :  { %v2367_v39 = vpop.xlane.xlu0 %2366 }
 0xcd0   :  { %v2371_v54 = vmul.f32 0.03125, %v2367_v39 }
 0xcd2   :  { %v2373_v23 = vadd.f32 1e-06, %v2371_v54 }
 0xcd3   :  { %v2370_v40 = vpop.xlane.xlu0 %2369 }
 0xcd4   :  { %3189 = vrsqrt.f32 %v2373_v23  ;;  %v2372_v43 = vmul.f32 0.03125, %v2370_v40 }
 0xcd6   :  { %v2374_v46 = vadd.f32 1e-06, %v2372_v43 }
 0xcd7   :  { %v2419_v56 = vpop.permute.xlu0 %2418 }
 0xcd8   :  { %3191 = vrsqrt.f32 %v2374_v46 }
 0xcde   :  { %v3190_v42 = vpop.eup %3189 }
 0xcdf   :  { %v2377_v58 = vmul.f32 %v3190_v42, %v2361_v61 }
 0xce1   :  { %v2422_v33 = vmul.f32 %v2417_v55, %v2377_v58 }
 0xce2   :  { %v3192_v48 = vpop.eup %3191 }
 0xce3   :  { %v2378_v62 = vmul.f32 %v3192_v48, %v2362_v20  ;;  %v2434_v1 = vadd.f32 %v2427_v37, %v2422_v33 }
 0xce5   :  { %v2423_v60 = vmul.f32 %v2419_v56, %v2378_v62 }
 0xce7   :  { %v2435_v2 = vadd.f32 %v2431_v59, %v2423_v60 }
 0xce9   :  { %v2713_v5 = vpack.c.bf16 %v2435_v2, %v2434_v1 }
 0xceb   :  { %3021 = vmatmul.mubr.msk.bf16.vlgmr.msra.gmra.mrb[60].mxu0 %vm156_vm0, %v2713_v5 }
 0xdbe   :  { %v2503_v6 = vpop.f32.mrb[60].mxu0 }
 0xdbf   :  { %v2504_v7 = vadd.f32 %v2697_v3, %v2503_v6  ;;  %v3022_v8 = vpop.f32.mrb[61].mxu0 }
 0xdc0   :  { %v2506_v9 = vpop.f32.mrb[62].mxu0 }
 0xdc1   :  { %v2510_v52 = vmax.f32 %v2504_v7, 0.0  ;;  %v2507_v41 = vadd.f32 %v2697_v3, %v2506_v9  ;;  %v3023_v10 = vpop.f32.mrb[63].mxu0 }
 0xdc3   :  { %v2511_v29 = vmax.f32 %v2507_v41, 0.0  ;;  %v2512_v45 = vmul.f32 %v2510_v52, %v2510_v52 }
 0xdc5   :  { %v2513_v12 = vmul.f32 %v2511_v29, %v2511_v29 }
 0xdc7   :  { %v2514_v0 = vpack.c.bf16 %v2513_v12, %v2512_v45 }
 0xdc9   :  { %3041 = vmatmul.mubr.bf16.vlgmr.msra.gmra.mrb[52].mxu1 %v2514_v0 }
 0xe9c   :  { %v2620_v16 = vpop.f32.mrb[52].mxu1 }
 0xe9d   :  { %v2621_v11 = vadd.f32 %v2702_v15, %v2620_v16  ;;  %v3042_v21 = vpop.f32.mrb[53].mxu1 }
 0xe9e   :  { %v2623_v36 = vpop.f32.mrb[54].mxu1 }
 0xe9f   :  { %v2627_v14 = vadd.f32 %v2621_v11, %v4009_v22  ;;  %v2624_v25 = vadd.f32 %v2702_v15, %v2623_v36  ;;  %v3043_v17 = vpop.f32.mrb[55].mxu1 }
 0xea1   :  { %2629 = vst.msk [vmem:[#allocation14] sm:$0xff] %vm156_vm0, %v2627_v14  ;;  %v2628_v27 = vadd.f32 %v2624_v25, %v4014_v24 }
 0xea3   :  { %2630 = vst.msk [vmem:[#allocation14 + $0x8] sm:$0xff] %vm156_vm0, %v2628_v27 }
 0xea4   :  { %3338 = shalt.err (!%p3335_p10)
}
 0xea5   :  { %s3339_s4 = scalar_lea.hbm %s4111_s13, 256 }
 0xea6   :  { %p3340_p11 = scmp.ne.s32.totalorder %s4111_s13, %s3339_s4  ;;  %p3343_p12 = scmp.lt.u32.totalorder %s3339_s4, %s4111_s13 }
 0xea8   :  { %p3345_p13 = pnand %p3343_p12, %p3340_p11 }
 0xeaa   :  { %3348 = shalt.err (!%p3345_p13)
}
 0xeab   :  { %2642 = dma.vmem_to_hbm [thread:$0]  %s2637_s11, 256, %s4111_s13, [#allocation5], %s3362_s6, %s3362_s6, %s3363_s28  }
 0xeac   :  { %3357 = dma.done.wait [#allocation5], 256  }
 0xead   :  { %3358 = vsyncadd [#allocation5], 4294967040 }
 0xeae   :  { %2646 = vsyncpa [#allocation4], 1 }
 0xeaf   :  { %2647 = vsyncpa [#allocation7], 1 }
 0xeb0   :  { %2648 = vsyncpa [#allocation10], 1 }
 0xeb1   :  { %2649 = vsyncpa [#allocation13], 1 }
 0xeb2   :  { %2650 = vsyncpa [#allocation5], 1 }

</bundles_post_ra>
